<compile_context>
chip_gen: v5e
topology: v5e:2x2
jax: 0.10.0
libtpu: 0.0.40
codegen_flags: <defaults>
</compile_context>

<pallas_src>
import jax
import jax.numpy as jnp
from jax import lax
from jax.experimental import pallas as pl
from jax.experimental.pallas import tpu as pltpu

BN_EPS = 1e-3


def _fused_add_conv1x1_bn_kernel(a_ref, b_ref, w_ref, gb_ref, o_ref):
    # a_ref, b_ref : [Cin,  M]   f32  (x147, x132 channel-major; resident across tiles)
    # w_ref        : [Ct,  Cin]  bf16 (conv weight tile, Ct = Cout tile)
    # gb_ref       : [Ct,  2]    f32  (col 0 = gamma, col 1 = beta)
    # o_ref        : [Ct,  M]    f32
    #
    # f32 add (matches PyTorch ordering), then a single bf16 cast for the MXU.
    xb = (a_ref[...] + b_ref[...]).astype(jnp.bfloat16)                 # [Cin, M]

    # 1x1 conv == matmul on the MXU, f32 accumulation.
    y = jnp.dot(w_ref[...], xb, preferred_element_type=jnp.float32)     # [Ct, M]

    # Training-mode BatchNorm (biased variance) over M = N*H*W for this
    # channel tile; s1 and s2 share the same sweep over y.
    inv_m = 1.0 / y.shape[1]
    s1 = jnp.sum(y, axis=1, keepdims=True)                              # [Ct, 1]
    s2 = jnp.sum(y * y, axis=1, keepdims=True)                          # [Ct, 1]
    mean = s1 * inv_m
    var = jnp.maximum(s2 * inv_m - mean * mean, 0.0)

    # Folded per-channel affine -> 2 VPU ops/element epilogue (rsqrt on EUP).
    scale = gb_ref[:, 0:1] * lax.rsqrt(var + BN_EPS)                    # [Ct, 1]
    shift = gb_ref[:, 1:2] - mean * scale                               # [Ct, 1]
    o_ref[...] = y * scale + shift


def fused_add_conv1x1_bn(x147, x132, conv_w, bn_gamma, bn_beta, *, cout_tile=96):
    """x147, x132: [N, Cin, H, W] (NCHW); conv_w: [Cout, Cin, 1, 1];
    bn_gamma/bn_beta: [Cout].  Returns [N, Cout, H, W] (NCHW), float32."""
    n, cin, h, w = x147.shape
    cout = conv_w.shape[0]
    m = n * h * w

    if cout % cout_tile != 0:
        cout_tile = cout
    n_tiles = cout // cout_tile

    # Channel-major flat view [Cin, N*H*W].  For N == 1 the moveaxis is a
    # bitcast (size-1 axis), so no transpose / extra HBM traffic is issued.
    a2d = jnp.moveaxis(x147, 1, 0).reshape(cin, m).astype(jnp.float32)
    b2d = jnp.moveaxis(x132, 1, 0).reshape(cin, m).astype(jnp.float32)

    w2d = conv_w.reshape(cout, cin).astype(jnp.bfloat16)                # [Cout, Cin]
    gb = jnp.stack([bn_gamma, bn_beta], axis=1).astype(jnp.float32)     # [Cout, 2]

    cost = pl.CostEstimate(
        flops=2 * cout * cin * m + 8 * cout * m,
        transcendentals=cout,
        bytes_accessed=(2 * cin * m) * 4          # two f32 inputs
                       + (cout * cin) * 2         # bf16 weight
                       + (cout * 2) * 4           # packed gamma/beta
                       + (cout * m) * 4,          # f32 output
    )

    # TODO(synk): PyTorch training-mode BN also updates running_mean/running_var
    # (unbiased var, momentum=0.01) as module state; the returned tensor does
    # not depend on them, so only the forward output is produced here.
    out2d = pl.pallas_call(
        _fused_add_conv1x1_bn_kernel,
        out_shape=jax.ShapeDtypeStruct((cout, m), jnp.float32),
        grid_spec=pltpu.PrefetchScalarGridSpec(
            num_scalar_prefetch=0,
            grid=(n_tiles,),
            in_specs=[
                pl.BlockSpec((cin, m), lambda i: (0, 0)),            # x147 (resident)
                pl.BlockSpec((cin, m), lambda i: (0, 0)),            # x132 (resident)
                pl.BlockSpec((cout_tile, cin), lambda i: (i, 0)),    # weight tile
                pl.BlockSpec((cout_tile, 2), lambda i: (i, 0)),      # gamma|beta tile
            ],
            out_specs=pl.BlockSpec((cout_tile, m), lambda i: (i, 0)),
        ),
        compiler_params=pltpu.CompilerParams(
            dimension_semantics=("parallel",)),
        cost_estimate=cost,
    )(a2d, b2d, w2d, gb)

    # [Cout, N*H*W] -> NCHW, again layout-free for N == 1.
    return jnp.moveaxis(out2d.reshape(cout, n, h, w), 0, 1)


if __name__ == "__main__":
    key = jax.random.PRNGKey(0)
    k1, k2, k3, k4, k5 = jax.random.split(key, 5)

    N, CIN, H, W = 1, 64, 28, 28
    COUT = 384

    # Deterministic synthetic inputs / parameters (module shapes).
    x147 = jax.random.normal(k1, (N, CIN, H, W), dtype=jnp.float32)
    x132 = jax.random.normal(k2, (N, CIN, H, W), dtype=jnp.float32)
    conv_w = jax.random.normal(k3, (COUT, CIN, 1, 1), dtype=jnp.float32) * 0.05
    bn_gamma = 1.0 + 0.1 * jax.random.normal(k4, (COUT,), dtype=jnp.float32)
    bn_beta = 0.1 * jax.random.normal(k5, (COUT,), dtype=jnp.float32)

    fwd = jax.jit(fused_add_conv1x1_bn)
    out = fwd(x147, x132, conv_w, bn_gamma, bn_beta)
    jax.block_until_ready(out)

    # Pure-JAX f32 reference (add -> 1x1 conv -> training-mode BN, batch stats).
    xs = x147 + x132
    y = jnp.einsum("nchw,oc->nohw", xs, conv_w.reshape(COUT, CIN))
    mu = jnp.mean(y, axis=(0, 2, 3), keepdims=True)
    var = jnp.mean((y - mu) ** 2, axis=(0, 2, 3), keepdims=True)
    ref = (y - mu) * lax.rsqrt(var + BN_EPS) * bn_gamma[None, :, None, None] \
        + bn_beta[None, :, None, None]

    assert out.shape == (N, COUT, H, W)
    err = float(jnp.max(jnp.abs(out - ref)))
    # bf16 MXU operands (f32 add + f32 accumulation) -> loosened tolerance vs f32 ref.
    assert err < 5e-2, f"max abs err {err}"

    print("KERNEL_OK")
</pallas_src>

<mosaic_0001>
module attributes {stable_mosaic.version = 11 : i64} {
  func.func @_fused_add_conv1x1_bn_kernel(%arg0: i32, %arg1: memref<64x784xf32, #tpu.memory_space<vmem>>, %arg2: memref<64x784xf32, #tpu.memory_space<vmem>>, %arg3: memref<96x64xbf16, #tpu.memory_space<vmem>>, %arg4: memref<96x2xf32, #tpu.memory_space<vmem>>, %arg5: memref<96x784xf32, #tpu.memory_space<vmem>>) attributes {dimension_semantics = [#tpu.dimension_semantics<parallel>], iteration_bounds = array<i64: 4>, scalar_prefetch = 0 : i64, scratch_operands = 0 : i64, tpu.core_type = #tpu.core_type<tc>, window_params = [{pipeline_mode = #tpu.pipeline_mode<synchronous>, transform_indices = @transform_0, window_bounds = array<i64: 64, 784>}, {pipeline_mode = #tpu.pipeline_mode<synchronous>, transform_indices = @transform_1, window_bounds = array<i64: 64, 784>}, {transform_indices = @transform_2, window_bounds = array<i64: 96, 64>}, {transform_indices = @transform_3, window_bounds = array<i64: 96, 2>}, {transform_indices = @transform_4, window_bounds = array<i64: 96, 784>}]} {
    %c0 = arith.constant 0 : index
    %c0_0 = arith.constant 0 : index
    %0 = vector.load %arg1[%c0, %c0_0] : memref<64x784xf32, #tpu.memory_space<vmem>>, vector<64x784xf32>
    %c0_1 = arith.constant 0 : index
    %c0_2 = arith.constant 0 : index
    %1 = vector.load %arg2[%c0_1, %c0_2] : memref<64x784xf32, #tpu.memory_space<vmem>>, vector<64x784xf32>
    %2 = arith.addf %0, %1 : vector<64x784xf32>
    %3 = arith.truncf %2 : vector<64x784xf32> to vector<64x784xbf16>
    %c0_3 = arith.constant 0 : index
    %c0_4 = arith.constant 0 : index
    %4 = vector.load %arg3[%c0_3, %c0_4] : memref<96x64xbf16, #tpu.memory_space<vmem>>, vector<96x64xbf16>
    %cst = arith.constant dense<0.000000e+00> : vector<96x784xf32>
    %5 = tpu.matmul %4, %3, %cst {dimension_numbers = #tpu.dot_dimension_numbers<[1], [0], [0], [1], [0, 0, 1, 1], [], []>} : vector<96x64xbf16>, vector<64x784xbf16>, vector<96x784xf32> -> vector<96x784xf32>
    %cst_5 = arith.constant dense<0.000000e+00> : vector<96xf32>
    %6 = vector.multi_reduction <add>, %5, %cst_5 [1] : vector<96x784xf32> to vector<96xf32>
    %7 = vector.shape_cast %6 : vector<96xf32> to vector<96x1xf32>
    %8 = arith.mulf %5, %5 : vector<96x784xf32>
    %cst_6 = arith.constant dense<0.000000e+00> : vector<96xf32>
    %9 = vector.multi_reduction <add>, %8, %cst_6 [1] : vector<96x784xf32> to vector<96xf32>
    %10 = vector.shape_cast %9 : vector<96xf32> to vector<96x1xf32>
    %cst_7 = arith.constant 0.00127551018 : f32
    %11 = vector.broadcast %cst_7 : f32 to vector<96x1xf32>
    %12 = arith.mulf %7, %11 : vector<96x1xf32>
    %cst_8 = arith.constant 0.00127551018 : f32
    %13 = vector.broadcast %cst_8 : f32 to vector<96x1xf32>
    %14 = arith.mulf %10, %13 : vector<96x1xf32>
    %15 = arith.mulf %12, %12 : vector<96x1xf32>
    %16 = arith.subf %14, %15 : vector<96x1xf32>
    %cst_9 = arith.constant 0.000000e+00 : f32
    %17 = vector.broadcast %cst_9 : f32 to vector<96x1xf32>
    %18 = arith.maximumf %16, %17 : vector<96x1xf32>
    %c0_10 = arith.constant 0 : index
    %c0_11 = arith.constant 0 : index
    %19 = vector.load %arg4[%c0_10, %c0_11] : memref<96x2xf32, #tpu.memory_space<vmem>>, vector<96x1xf32>
    %cst_12 = arith.constant 1.000000e-03 : f32
    %20 = vector.broadcast %cst_12 : f32 to vector<96x1xf32>
    %21 = arith.addf %18, %20 : vector<96x1xf32>
    %22 = math.rsqrt %21 : vector<96x1xf32>
    %23 = arith.mulf %19, %22 : vector<96x1xf32>
    %c0_13 = arith.constant 0 : index
    %c1 = arith.constant 1 : index
    %24 = vector.load %arg4[%c0_13, %c1] : memref<96x2xf32, #tpu.memory_space<vmem>>, vector<96x1xf32>
    %25 = arith.mulf %12, %23 : vector<96x1xf32>
    %26 = arith.subf %24, %25 : vector<96x1xf32>
    %27 = vector.broadcast %23 : vector<96x1xf32> to vector<96x784xf32>
    %28 = arith.mulf %5, %27 : vector<96x784xf32>
    %29 = vector.broadcast %26 : vector<96x1xf32> to vector<96x784xf32>
    %30 = arith.addf %28, %29 : vector<96x784xf32>
    %c0_14 = arith.constant 0 : index
    %c0_15 = arith.constant 0 : index
    %31 = vector.load %arg5[%c0_14, %c0_15] : memref<96x784xf32, #tpu.memory_space<vmem>>, vector<96x784xf32>
    tpu.vector_store %arg5[%c0_14, %c0_15], %30 {strides = array<i32>} : memref<96x784xf32, #tpu.memory_space<vmem>>, vector<96x784xf32>,
    return
  }
  func.func @transform_0(%arg0: i32) -> (i32, i32) {
    %c0_i32 = arith.constant 0 : i32
    %c0_i32_0 = arith.constant 0 : i32
    %c0_i32_1 = arith.constant 0 : i32
    return %c0_i32, %c0_i32_0 : i32, i32
  }
  func.func @transform_1(%arg0: i32) -> (i32, i32) {
    %c0_i32 = arith.constant 0 : i32
    %c0_i32_0 = arith.constant 0 : i32
    %c0_i32_1 = arith.constant 0 : i32
    return %c0_i32, %c0_i32_0 : i32, i32
  }
  func.func @transform_2(%arg0: i32) -> (i32, i32) {
    %c0_i32 = arith.constant 0 : i32
    %c0_i32_0 = arith.constant 0 : i32
    return %arg0, %c0_i32 : i32, i32
  }
  func.func @transform_3(%arg0: i32) -> (i32, i32) {
    %c0_i32 = arith.constant 0 : i32
    %c0_i32_0 = arith.constant 0 : i32
    return %arg0, %c0_i32 : i32, i32
  }
  func.func @transform_4(%arg0: i32) -> (i32, i32) {
    %c0_i32 = arith.constant 0 : i32
    %c0_i32_0 = arith.constant 0 : i32
    return %arg0, %c0_i32 : i32, i32
  }
}

</mosaic_0001>

<bundles_post_ra>
// kernel: fused_add_conv1x1_bn.1
= control target key start
LH: loop header
LB: loop body
LE: loop exit
PB: predicated region body
PF: predicated region fallthrough
CT: control target
= control target key end

     0   :  { %s1959_s15 = smov 0   ;;  %s3299_s0 = inlined_call_operand.vmem [shape: f32[64,784], index: 0, kind: input, shape index: {}]   ;;  %s3300_s1 = inlined_call_operand.vmem [shape: f32[64,784], index: 1, kind: input, shape index: {}]   ;;  %s3301_s2 = inlined_call_operand.vmem [shape: bf16[384,64], index: 2, kind: input, shape index: {}]   ;;  %s3302_s3 = inlined_call_operand.vmem [shape: f32[384,2], index: 3, kind: input, shape index: {}]   ;;  %s3303_s4 = inlined_call_operand.vmem [shape: f32[384,784], index: 4, kind: output, shape index: {}]  }
   0x1 LB: > { %s1787_s16 = sadd.s32 4294967295, %s1929_s15   ;;  %p1791_p0 = scmp.ge.s32.totalorder %s1929_s15, 1  ;;  %s1929_s15 = sphi %s1959_s15, %s14_s15  }
   0x2   : > { %p174_p1 = scmp.lt.s32.totalorder %s1929_s15, 5 }
   0x4   : > { %p175_p2 = pnand %p1791_p0, %p174_p1 }
   0x6   : > { %178 = sbr.rel (%p175_p2) target bundleno = 720 (0x2d0), region = 36 }
   0xb   : > { %v268_v0 = vld [vmem:[%s3299_s0 + $0x150] sm:$0xff]  ;;  %v275_v1 = vld [vmem:[%s3299_s0 + $0x188] sm:$0xff]  ;;  %s1976_s23 = smul.u32 12, %s1787_s16  ;;  %v270_v5 = vld [vmem:[%s3299_s0 + $0x160] sm:$0xff]  ;;  %vm464_vm0 = vcmask 523264   ;;  %vm761_vm1 = vcmask 130048  }
   0xc   : > { %v324_v2 = vld [vmem:[%s3300_s1 + $0x150] sm:$0xff]  ;;  %v331_v3 = vld [vmem:[%s3300_s1 + $0x188] sm:$0xff]  ;;  %v277_v6 = vld [vmem:[%s3299_s0 + $0x198] sm:$0xff]  ;;  %s1932_s14 = smov 1  }
   0xd   : > { %v380_v4 = vadd.f32 %v324_v2, %v268_v0  ;;  %v387_v7 = vadd.f32 %v331_v3, %v275_v1  ;;  %v326_v8 = vld [vmem:[%s3300_s1 + $0x160] sm:$0xff]  ;;  %v333_v9 = vld [vmem:[%s3300_s1 + $0x198] sm:$0xff]  ;;  %p207_p3 = scmp.lt.s32.totalorder %s1976_s23, 47  ;;  %v276_v13 = vld [vmem:[%s3299_s0 + $0x190] sm:$0xff] }
   0xe   : > { %v269_v10 = vld [vmem:[%s3299_s0 + $0x158] sm:$0xff]  ;;  %v382_v11 = vadd.f32 %v326_v8, %v270_v5  ;;  %v389_v12 = vadd.f32 %v333_v9, %v277_v6  ;;  %v332_v15 = vld [vmem:[%s3300_s1 + $0x190] sm:$0xff]  ;;  %v254_v19 = vld [vmem:[%s3299_s0 + $0xe0] sm:$0xff] }
   0xf   : > { %v325_v14 = vld [vmem:[%s3300_s1 + $0x158] sm:$0xff]  ;;  %v415_v16 = vpack.c.bf16 %v387_v7, %v380_v4  ;;  %v388_v18 = vadd.f32 %v332_v15, %v276_v13  ;;  %v310_v21 = vld [vmem:[%s3300_s1 + $0xe0] sm:$0xff]  ;;  %v256_v25 = vld [vmem:[%s3299_s0 + $0xf0] sm:$0xff]  ;;  %s3470_s23 = smov (!%p207_p3, %s1976_s23), 47 }
  0x10   : > { %v381_v17 = vadd.f32 %v325_v14, %v269_v10  ;;  %v261_v20 = vld [vmem:[%s3299_s0 + $0x118] sm:$0xff]  ;;  %v2015_v22 = vpack.c.bf16 %v389_v12, %v382_v11  ;;  %v366_v24 = vadd.f32 %v310_v21, %v254_v19  ;;  %v263_v26 = vld [vmem:[%s3299_s0 + $0x128] sm:$0xff]  ;;  %v312_v29 = vld [vmem:[%s3300_s1 + $0xf0] sm:$0xff]  ;;  %s1792_s10 = sshll.u32 %s3470_s23, 2 }
  0x11   : > { %v317_v23 = vld [vmem:[%s3300_s1 + $0x118] sm:$0xff]  ;;  %1869 = vmatpush.bf16.msra.mxu3 %v415_v16  ;;  %487 = vmatpush.bf16.msra.mxu0 %v415_v16  ;;  %v319_v30 = vld [vmem:[%s3300_s1 + $0x128] sm:$0xff]  ;;  %v368_v32 = vadd.f32 %v312_v29, %v256_v25  ;;  %v262_v34 = vld [vmem:[%s3299_s0 + $0x120] sm:$0xff]  ;;  %s2119_s7 = scalar_lea.vmem %s3301_s2, %s1792_s10  ;;  %s1881_s10 = smul.u32 56, %s3470_s23 }
  0x12   : > { %v2026_v27 = vpack.c.bf16 %v388_v18, %v381_v17  ;;  %v373_v28 = vadd.f32 %v317_v23, %v261_v20  ;;  %v255_v31 = vld [vmem:[%s3299_s0 + $0xe8] sm:$0xff]  ;;  %1877 = vmatpush.bf16.msra.mxu2 %v2015_v22  ;;  %v375_v33 = vadd.f32 %v319_v30, %v263_v26  ;;  %v318_v36 = vld [vmem:[%s3300_s1 + $0x120] sm:$0xff]  ;;  %v240_v40 = vld [vmem:[%s3299_s0 + $0x70] sm:$0xff] }
  0x13   : > { %v311_v35 = vld [vmem:[%s3300_s1 + $0xe8] sm:$0xff]  ;;  %v374_v39 = vadd.f32 %v318_v36, %v262_v34  ;;  %v296_v42 = vld [vmem:[%s3300_s1 + $0x70] sm:$0xff]  ;;  %v242_v46 = vld [vmem:[%s3299_s0 + $0x80] sm:$0xff]  ;;  %s3034_s18 = scalar_lea.vmem %s3303_s4, %s1881_s10 }
  0x14   : > { %1873 = vmatpush.bf16.msra.mxu1 %v2026_v27  ;;  %v408_v37 = vpack.c.bf16 %v373_v28, %v366_v24  ;;  %v367_v38 = vadd.f32 %v311_v35, %v255_v31  ;;  %v247_v41 = vld [vmem:[%s3299_s0 + $0xa8] sm:$0xff]  ;;  %v2062_v43 = vpack.c.bf16 %v375_v33, %v368_v32  ;;  %v352_v45 = vadd.f32 %v296_v42, %v240_v40  ;;  %v249_v47 = vld [vmem:[%s3299_s0 + $0xb8] sm:$0xff]  ;;  %v298_v50 = vld [vmem:[%s3300_s1 + $0x80] sm:$0xff] }
  0x15   : > { %v303_v44 = vld [vmem:[%s3300_s1 + $0xa8] sm:$0xff]  ;;  %v305_v51 = vld [vmem:[%s3300_s1 + $0xb8] sm:$0xff]  ;;  %v354_v53 = vadd.f32 %v298_v50, %v242_v46  ;;  %v248_v55 = vld [vmem:[%s3299_s0 + $0xb0] sm:$0xff] }
  0x16   : > { %1870 = vmatpush.bf16.msra.mxu3 %v408_v37  ;;  %488 = vmatpush.bf16.msra.mxu0 %v408_v37  ;;  %v2073_v48 = vpack.c.bf16 %v374_v39, %v367_v38  ;;  %v359_v49 = vadd.f32 %v303_v44, %v247_v41  ;;  %v241_v52 = vld [vmem:[%s3299_s0 + $0x78] sm:$0xff]  ;;  %v361_v54 = vadd.f32 %v305_v51, %v249_v47  ;;  %v304_v57 = vld [vmem:[%s3300_s1 + $0xb0] sm:$0xff]  ;;  %v226_v61 = vld [vmem:[%s3299_s0] sm:$0xff] }
  0x17   : > { %1878 = vmatpush.bf16.msra.mxu2 %v2062_v43  ;;  %v297_v56 = vld [vmem:[%s3300_s1 + $0x78] sm:$0xff]  ;;  %v360_v60 = vadd.f32 %v304_v57, %v248_v55  ;;  %v282_v63 = vld [vmem:[%s3300_s1] sm:$0xff]  ;;  %v228_v3 = vld [vmem:[%s3299_s0 + $0x10] sm:$0xff] }
  0x18   : > { %1874 = vmatpush.bf16.msra.mxu1 %v2073_v48  ;;  %v401_v58 = vpack.c.bf16 %v359_v49, %v352_v45  ;;  %v353_v59 = vadd.f32 %v297_v56, %v241_v52  ;;  %v233_v62 = vld [vmem:[%s3299_s0 + $0x38] sm:$0xff]  ;;  %v2105_v0 = vpack.c.bf16 %v361_v54, %v354_v53  ;;  %v338_v2 = vadd.f32 %v282_v63, %v226_v61  ;;  %v235_v4 = vld [vmem:[%s3299_s0 + $0x48] sm:$0xff]  ;;  %v284_v7 = vld [vmem:[%s3300_s1 + $0x10] sm:$0xff] }
  0x19   : > { %v289_v1 = vld [vmem:[%s3300_s1 + $0x38] sm:$0xff]  ;;  %v291_v8 = vld [vmem:[%s3300_s1 + $0x48] sm:$0xff]  ;;  %v340_v10 = vadd.f32 %v284_v7, %v228_v3  ;;  %v234_v12 = vld [vmem:[%s3299_s0 + $0x40] sm:$0xff] }
  0x1a   : > { %1871 = vmatpush.bf16.msra.mxu3 %v401_v58  ;;  %489 = vmatpush.bf16.msra.mxu0 %v401_v58  ;;  %v2121_v5 = vpack.c.bf16 %v360_v60, %v353_v59  ;;  %v345_v6 = vadd.f32 %v289_v1, %v233_v62  ;;  %v227_v9 = vld [vmem:[%s3299_s0 + $0x8] sm:$0xff]  ;;  %v347_v11 = vadd.f32 %v291_v8, %v235_v4  ;;  %v290_v14 = vld [vmem:[%s3300_s1 + $0x40] sm:$0xff]  ;;  %v281_v31 = vld [vmem:[%s3299_s0 + $0x1b8] sm:$0xff] }
  0x1b   : > { %1879 = vmatpush.bf16.msra.mxu2 %v2105_v0  ;;  %v283_v13 = vld [vmem:[%s3300_s1 + $0x8] sm:$0xff]  ;;  %v346_v17 = vadd.f32 %v290_v14, %v234_v12  ;;  %v278_v20 = vld [vmem:[%s3299_s0 + $0x1a0] sm:$0xff]  ;;  %v337_v33 = vld [vmem:[%s3300_s1 + $0x1b8] sm:$0xff] }
  0x1c   : > { %1875 = vmatpush.bf16.msra.mxu1 %v2121_v5  ;;  %v394_v15 = vpack.c.bf16 %v345_v6, %v338_v2  ;;  %v339_v16 = vadd.f32 %v283_v13, %v227_v9  ;;  %v2144_v18 = vld [vmem:[%s2119_s7 + $0x8] sm:$0xff]  ;;  %v2152_v21 = vpack.c.bf16 %v347_v11, %v340_v10  ;;  %v334_v24 = vld [vmem:[%s3300_s1 + $0x1a0] sm:$0xff]  ;;  %v273_v35 = vld [vmem:[%s3299_s0 + $0x178] sm:$0xff]  ;;  %v393_v38 = vadd.f32 %v337_v33, %v281_v31 }
  0x1d   : > { %v271_v19 = vld [vmem:[%s3299_s0 + $0x168] sm:$0xff]  ;;  %v2161_v25 = vld [vmem:[%s2119_s7] sm:$0xff]  ;;  %v390_v29 = vadd.f32 %v334_v24, %v278_v20  ;;  %v280_v36 = vld [vmem:[%s3299_s0 + $0x1b0] sm:$0xff] }
  0x1e   : > { %v327_v23 = vld [vmem:[%s3300_s1 + $0x168] sm:$0xff]  ;;  %1872 = vmatpush.bf16.msra.mxu3 %v394_v15  ;;  %490 = vmatpush.bf16.msra.mxu0 %v394_v15  ;;  %v2163_v26 = vpack.c.bf16 %v346_v17, %v339_v16  ;;  %v274_v30 = vld [vmem:[%s3299_s0 + $0x180] sm:$0xff]  ;;  %v336_v39 = vld [vmem:[%s3300_s1 + $0x1b0] sm:$0xff] }
  0x1f   : > { %v383_v28 = vadd.f32 %v327_v23, %v271_v19  ;;  %v330_v32 = vld [vmem:[%s3300_s1 + $0x180] sm:$0xff]  ;;  %1880 = vmatpush.bf16.msra.mxu2 %v2152_v21  ;;  %v392_v41 = vadd.f32 %v336_v39, %v280_v36  ;;  %v257_v42 = vld [vmem:[%s3299_s0 + $0xf8] sm:$0xff]  ;;  %v264_v44 = vld [vmem:[%s3299_s0 + $0x130] sm:$0xff] }
  0x20   : > { %v386_v34 = vadd.f32 %v330_v32, %v274_v30  ;;  %1876 = vmatpush.bf16.msra.mxu1 %v2163_v26  ;;  %v313_v45 = vld [vmem:[%s3300_s1 + $0xf8] sm:$0xff]  ;;  %v320_v47 = vld [vmem:[%s3300_s1 + $0x130] sm:$0xff]  ;;  %v267_v51 = vld [vmem:[%s3299_s0 + $0x148] sm:$0xff] }
  0x21   : > { %v418_v37 = vpack.c.bf16 %v390_v29, %v383_v28  ;;  %1820 = vmatmul.msk.bf16.vlgmr.msra.gmra.mxu3 %vm464_vm0, %v2144_v18  ;;  %1819 = vmatmul.msk.bf16.vlgmr.msra.gmra.mxu0 %vm464_vm0, %v2161_v25  ;;  %v369_v49 = vadd.f32 %v313_v45, %v257_v42  ;;  %v260_v50 = vld [vmem:[%s3299_s0 + $0x110] sm:$0xff]  ;;  %v376_v53 = vadd.f32 %v320_v47, %v264_v44  ;;  %v323_v55 = vld [vmem:[%s3300_s1 + $0x148] sm:$0xff]  ;;  %v322_v60 = vld [vmem:[%s3300_s1 + $0x140] sm:$0xff] }
  0x22   : > { %526 = vmatpush.bf16.msrb.mxu0 %v2026_v27  ;;  %v329_v27 = vld [vmem:[%s3300_s1 + $0x178] sm:$0xff]  ;;  %1832 = vmatmul.msk.bf16.vlgmr.msra.gmra.mxu2 %vm464_vm0, %v2144_v18  ;;  %v421_v46 = vpack.c.bf16 %v393_v38, %v386_v34  ;;  %v316_v54 = vld [vmem:[%s3300_s1 + $0x110] sm:$0xff]  ;;  %v259_v56 = vld [vmem:[%s3299_s0 + $0x108] sm:$0xff]  ;;  %v379_v58 = vadd.f32 %v323_v55, %v267_v51 }
  0x23   : > { %v385_v40 = vadd.f32 %v329_v27, %v273_v35  ;;  %604 = vmatpush.bf16.msrb.mxu3 %v418_v37  ;;  %1826 = vmatmul.msk.bf16.vlgmr.msra.gmra.mxu1 %vm464_vm0, %v2144_v18  ;;  %v372_v57 = vadd.f32 %v316_v54, %v260_v50  ;;  %v315_v59 = vld [vmem:[%s3300_s1 + $0x108] sm:$0xff]  ;;  %v411_v61 = vpack.c.bf16 %v376_v53, %v369_v49  ;;  %v250_v2 = vld [vmem:[%s3299_s0 + $0xc0] sm:$0xff]  ;;  %v253_v11 = vld [vmem:[%s3299_s0 + $0xd8] sm:$0xff] }
  0x24   : > { %721 = vmatpush.bf16.msrb.mxu2 %v421_v46  ;;  %v371_v62 = vadd.f32 %v315_v59, %v259_v56  ;;  %v243_v1 = vld [vmem:[%s3299_s0 + $0x88] sm:$0xff]  ;;  %v306_v6 = vld [vmem:[%s3300_s1 + $0xc0] sm:$0xff]  ;;  %v309_v13 = vld [vmem:[%s3300_s1 + $0xd8] sm:$0xff] }
  0x25   : > { %v420_v52 = vpack.c.bf16 %v392_v41, %v385_v40  ;;  %v414_v3 = vpack.c.bf16 %v379_v58, %v372_v57  ;;  %v299_v4 = vld [vmem:[%s3300_s1 + $0x88] sm:$0xff]  ;;  %v246_v7 = vld [vmem:[%s3299_s0 + $0xa0] sm:$0xff]  ;;  %v362_v10 = vadd.f32 %v306_v6, %v250_v2  ;;  %v2265_v17 = vld [vmem:[%s2119_s7 + $0x10] sm:$0xff] }
  0x26   : > { %527 = vmatpush.bf16.msrb.mxu0 %v2073_v48  ;;  %v266_v48 = vld [vmem:[%s3299_s0 + $0x140] sm:$0xff]  ;;  %v355_v9 = vadd.f32 %v299_v4, %v243_v1  ;;  %v301_v19 = vld [vmem:[%s3300_s1 + $0x98] sm:$0xff]  ;;  %v308_v20 = vld [vmem:[%s3300_s1 + $0xd0] sm:$0xff] }
  0x27   : > { %682 = vmatpush.bf16.msrb.mxu1 %v420_v52  ;;  %v378_v63 = vadd.f32 %v322_v60, %v266_v48  ;;  %605 = vmatpush.bf16.msrb.mxu3 %v411_v61  ;;  %v302_v12 = vld [vmem:[%s3300_s1 + $0xa0] sm:$0xff]  ;;  %v229_v24 = vld [vmem:[%s3299_s0 + $0x18] sm:$0xff]  ;;  %v272_v35 = vld [vmem:[%s3299_s0 + $0x170] sm:$0xff] }
  0x28   : > { %722 = vmatpush.bf16.msrb.mxu2 %v414_v3  ;;  %v358_v14 = vadd.f32 %v302_v12, %v246_v7  ;;  %v404_v15 = vpack.c.bf16 %v362_v10, %v355_v9  ;;  %v285_v29 = vld [vmem:[%s3300_s1 + $0x18] sm:$0xff]  ;;  %v279_v36 = vld [vmem:[%s3299_s0 + $0x1a8] sm:$0xff]  ;;  %v328_v37 = vld [vmem:[%s3300_s1 + $0x170] sm:$0xff] }
  0x29   : > { %v413_v8 = vpack.c.bf16 %v378_v63, %v371_v62  ;;  %v341_v30 = vadd.f32 %v285_v29, %v229_v24  ;;  %v2303_v34 = vld [vmem:[%s2119_s7 + $0x18] sm:$0xff]  ;;  %v384_v38 = vadd.f32 %v328_v37, %v272_v35  ;;  %v232_v40 = vld [vmem:[%s3299_s0 + $0x30] sm:$0xff]  ;;  %v239_v41 = vld [vmem:[%s3299_s0 + $0x68] sm:$0xff] }
  0x2a   : > { %528 = vmatpush.bf16.msrb.mxu0 %v2121_v5  ;;  %v365_v5 = vadd.f32 %v309_v13, %v253_v11  ;;  %v288_v42 = vld [vmem:[%s3300_s1 + $0x30] sm:$0xff]  ;;  %v295_v44 = vld [vmem:[%s3300_s1 + $0x68] sm:$0xff]  ;;  %v258_v46 = vld [vmem:[%s3299_s0 + $0x100] sm:$0xff] }
  0x2b   : > { %683 = vmatpush.bf16.msrb.mxu1 %v413_v8  ;;  %606 = vmatpush.bf16.msrb.mxu3 %v404_v15  ;;  %v344_v45 = vadd.f32 %v288_v42, %v232_v40  ;;  %v265_v47 = vld [vmem:[%s3299_s0 + $0x138] sm:$0xff]  ;;  %v351_v49 = vadd.f32 %v295_v44, %v239_v41  ;;  %v314_v50 = vld [vmem:[%s3300_s1 + $0x100] sm:$0xff]  ;;  %v231_v52 = vld [vmem:[%s3299_s0 + $0x28] sm:$0xff] }
  0x2c   : > { %v407_v16 = vpack.c.bf16 %v365_v5, %v358_v14  ;;  %v321_v51 = vld [vmem:[%s3300_s1 + $0x138] sm:$0xff]  ;;  %v370_v53 = vadd.f32 %v314_v50, %v258_v46  ;;  %v238_v55 = vld [vmem:[%s3299_s0 + $0x60] sm:$0xff]  ;;  %v287_v56 = vld [vmem:[%s3300_s1 + $0x28] sm:$0xff] }
  0x2d   : > { %v377_v54 = vadd.f32 %v321_v51, %v265_v47  ;;  %v294_v57 = vld [vmem:[%s3300_s1 + $0x60] sm:$0xff]  ;;  %v400_v58 = vpack.c.bf16 %v351_v49, %v344_v45  ;;  %v343_v48 = vadd.f32 %v287_v56, %v231_v52  ;;  %v244_v60 = vld [vmem:[%s3299_s0 + $0x90] sm:$0xff]  ;;  %v251_v61 = vld [vmem:[%s3299_s0 + $0xc8] sm:$0xff] }
  0x2e   : > { %529 = vmatpush.bf16.msrb.mxu0 %v2163_v26  ;;  %723 = vmatpush.bf16.msrb.mxu2 %v407_v16  ;;  %v236_v26 = vld [vmem:[%s3299_s0 + $0x50] sm:$0xff]  ;;  %v350_v59 = vadd.f32 %v294_v57, %v238_v55  ;;  %v307_v1 = vld [vmem:[%s3300_s1 + $0xc8] sm:$0xff]  ;;  %v230_v3 = vld [vmem:[%s3299_s0 + $0x20] sm:$0xff] }
  0x2f   : > { %v300_v62 = vld [vmem:[%s3300_s1 + $0x90] sm:$0xff]  ;;  %v412_v63 = vpack.c.bf16 %v377_v54, %v370_v53  ;;  %v237_v4 = vld [vmem:[%s3299_s0 + $0x58] sm:$0xff]  ;;  %v363_v7 = vadd.f32 %v307_v1, %v251_v61  ;;  %v286_v8 = vld [vmem:[%s3300_s1 + $0x20] sm:$0xff] }
  0x30   : > { %v356_v2 = vadd.f32 %v300_v62, %v244_v60  ;;  %v399_v6 = vpack.c.bf16 %v350_v59, %v343_v48  ;;  %v293_v9 = vld [vmem:[%s3300_s1 + $0x58] sm:$0xff]  ;;  %v342_v10 = vadd.f32 %v286_v8, %v230_v3  ;;  %v1867_v13 = vld [vmem:[%s2119_s7 + $0x20] sm:$0xff]  ;;  %v1868_v5 = vld [vmem:[%s2119_s7 + $0x28] sm:$0xff]  ;;  %s1793_s7 = sshll.u32 %s3470_s23, 3 }
  0x31   : > { %1821 = vmatmul.msk.bf16.gmra.mxu3 %vm464_vm0, %v2265_v17  ;;  %1825 = vmatmul.msk.bf16.vlgmr.msrb.gmra.mxu0 %vm464_vm0, %v2161_v25  ;;  %v349_v11 = vadd.f32 %v293_v9, %v237_v4  ;;  %s2895_s13 = scalar_lea.vmem %s3302_s3, %s1793_s7 }
  0x32   : > { %565 = vmatpush.bf16.msra.mxu0 %v2015_v22  ;;  %1833 = vmatmul.msk.bf16.gmra.mxu2 %vm464_vm0, %v2265_v17  ;;  %v245_v22 = vld [vmem:[%s3299_s0 + $0x98] sm:$0xff]  ;;  %v405_v12 = vpack.c.bf16 %v363_v7, %v356_v2 }
  0x33   : > { %1827 = vmatmul.msk.bf16.gmra.mxu1 %vm464_vm0, %v2265_v17  ;;  %v357_v23 = vadd.f32 %v301_v19, %v245_v22  ;;  %724 = vmatpush.bf16.msrb.mxu2 %v400_v58  ;;  %v398_v14 = vpack.c.bf16 %v349_v11, %v342_v10 }
  0x36   : > { %566 = vmatpush.bf16.msra.mxu0 %v2062_v43  ;;  %v252_v43 = vld [vmem:[%s3299_s0 + $0xd0] sm:$0xff] }
  0x37   : > { %v364_v28 = vadd.f32 %v308_v20, %v252_v43 }
  0x39   : > { %v406_v32 = vpack.c.bf16 %v364_v28, %v357_v23 }
  0x3a   : > { %567 = vmatpush.bf16.msra.mxu0 %v2105_v0  ;;  %v292_v0 = vld [vmem:[%s3300_s1 + $0x50] sm:$0xff] }
  0x3b   : > { %v348_v31 = vadd.f32 %v292_v0, %v236_v26  ;;  %684 = vmatpush.bf16.msrb.mxu1 %v406_v32 }
  0x3d   : > { %v397_v33 = vpack.c.bf16 %v348_v31, %v341_v30 }
  0x3e   : > { %568 = vmatpush.bf16.msra.mxu0 %v2152_v21  ;;  %v335_v21 = vld [vmem:[%s3300_s1 + $0x1a8] sm:$0xff] }
  0x3f   : > { %607 = vmatpush.bf16.msrb.mxu3 %v397_v33  ;;  %v391_v27 = vadd.f32 %v335_v21, %v279_v36  ;;  %685 = vmatpush.bf16.msrb.mxu1 %v399_v6 }
  0x41   : > { %1822 = vmatmul.msk.bf16.gmra.mxu3 %vm464_vm0, %v2303_v34  ;;  %1831 = vmatmul.msk.bf16.vlgmr.msra.gmra.mxu0 %vm464_vm0, %v2161_v25  ;;  %v419_v39 = vpack.c.bf16 %v391_v27, %v384_v38 }
  0x42   : > { %1834 = vmatmul.msk.bf16.gmra.mxu2 %vm464_vm0, %v2303_v34 }
  0x43   : > { %1828 = vmatmul.msk.bf16.gmra.mxu1 %vm464_vm0, %v2303_v34  ;;  %643 = vmatpush.bf16.msrb.mxu0 %v419_v39 }
  0x47   : > { %644 = vmatpush.bf16.msrb.mxu0 %v412_v63 }
  0x4b   : > { %645 = vmatpush.bf16.msrb.mxu0 %v405_v12 }
  0x4f   : > { %646 = vmatpush.bf16.msrb.mxu0 %v398_v14 }
  0x51   : > { %1823 = vmatmul.msk.bf16.gmra.mxu3 %vm464_vm0, %v1867_v13 }
  0x52   : > { %1835 = vmatmul.msk.bf16.gmra.mxu2 %vm464_vm0, %v1867_v13  ;;  %1843 = vmatmul.msk.bf16.vlgmr.msrb.gmra.mxu0 %vm464_vm0, %v2161_v25 }
  0x53   : > { %1829 = vmatmul.msk.bf16.gmra.mxu1 %vm464_vm0, %v1867_v13 }
  0x61   : > { %1824 = vmatmul.msk.bf16.gmra.mxu3 %vm464_vm0, %v1868_v5 }
  0x62   : > { %1836 = vmatmul.msk.bf16.gmra.mxu2 %vm464_vm0, %v1868_v5  ;;  %1844 = vmatmul.msk.bf16.gmra.mxu0 %vm464_vm0, %v2144_v18 }
  0x63   : > { %1830 = vmatmul.msk.bf16.gmra.mxu1 %vm464_vm0, %v1868_v5 }
  0x71   : > { %1837 = vmatmul.msk.bf16.vlgmr.msrb.gmra.mxu3 %vm464_vm0, %v2161_v25 }
  0x72   : > { %1855 = vmatmul.msk.bf16.vlgmr.msrb.gmra.mxu2 %vm464_vm0, %v2161_v25  ;;  %1845 = vmatmul.msk.bf16.gmra.mxu0 %vm464_vm0, %v2265_v17 }
  0x73   : > { %1849 = vmatmul.msk.bf16.vlgmr.msrb.gmra.mxu1 %vm464_vm0, %v2161_v25 }
  0x81   : > { %1838 = vmatmul.msk.bf16.gmra.mxu3 %vm464_vm0, %v2144_v18 }
  0x82   : > { %1856 = vmatmul.msk.bf16.gmra.mxu2 %vm464_vm0, %v2144_v18  ;;  %1846 = vmatmul.msk.bf16.gmra.mxu0 %vm464_vm0, %v2303_v34 }
  0x83   : > { %1850 = vmatmul.msk.bf16.gmra.mxu1 %vm464_vm0, %v2144_v18 }
  0x91   : > { %1839 = vmatmul.msk.bf16.gmra.mxu3 %vm464_vm0, %v2265_v17 }
  0x92   : > { %1857 = vmatmul.msk.bf16.gmra.mxu2 %vm464_vm0, %v2265_v17  ;;  %1847 = vmatmul.msk.bf16.gmra.mxu0 %vm464_vm0, %v1867_v13 }
  0x93   : > { %1851 = vmatmul.msk.bf16.gmra.mxu1 %vm464_vm0, %v2265_v17 }
  0x9e   : > { %v2433_v16 = vpop.f32.mrf.mxu0 }
  0x9f   : > { %v865_v52 = vmul.f32 %v2433_v16, %v2433_v16 }
  0xa0   : > { %v2420_v25 = vpop.f32.mrf.mxu1 }
  0xa1   : > { %1840 = vmatmul.msk.bf16.gmra.mxu3 %vm464_vm0, %v2303_v34 }
  0xa2   : > { %1858 = vmatmul.msk.bf16.gmra.mxu2 %vm464_vm0, %v2303_v34  ;;  %1848 = vmatmul.msk.bf16.gmra.mxu0 %vm464_vm0, %v1868_v5 }
  0xa3   : > { %1852 = vmatmul.msk.bf16.gmra.mxu1 %vm464_vm0, %v2303_v34 }
  0xa4   : > { %v2428_v18 = vpop.f32.mrf.mxu3 }
  0xa5   : > { %v2431_v15 = vpop.f32.mrf.mxu2 }
  0xa6   : > { %v2441_v19 = vpop.f32.mrf.mxu0 }
  0xa7   : > { %3361 = vst [vmem:[#allocation4_spill] sm:$0xff] %v2441_v19  ;;  %v872_v59 = vmul.f32 %v2441_v19, %v2441_v19 }
  0xa8   : > { %v2435_v17 = vpop.f32.mrf.mxu1 }
  0xa9   : > { %3359 = vst [vmem:[#allocation2_spill] sm:$0xff] %v2435_v17 }
  0xac   : > { %v2437_v22 = vpop.f32.mrf.mxu3 }
  0xad   : > { %3360 = vst [vmem:[#allocation3_spill] sm:$0xff] %v2437_v22  ;;  %v2439_v43 = vpop.f32.mrf.mxu2 }
  0xae   : > { %v2454_v28 = vpop.f32.mrf.mxu0 }
  0xaf   : > { %v866_v53 = vmul.f32 %v2454_v28, %v2454_v28  ;;  %v756_v55 = vadd.f32 %v2454_v28, %v2433_v16 }
  0xb0   : > { %v2443_v20 = vpop.f32.mrf.mxu1 }
  0xb1   : > { %1841 = vmatmul.msk.bf16.gmra.mxu3 %vm464_vm0, %v1867_v13  ;;  %v949_v57 = vadd.f32 %v866_v53, %v865_v52  ;;  %v880_v53 = vmul.f32 %v2420_v25, %v2420_v25 }
  0xb2   : > { %1859 = vmatmul.msk.bf16.gmra.mxu2 %vm464_vm0, %v1867_v13 }
  0xb3   : > { %1853 = vmatmul.msk.bf16.gmra.mxu1 %vm464_vm0, %v1867_v13 }
  0xb4   : > { %v2448_v23 = vpop.f32.mrf.mxu3 }
  0xb5   : > { %v2450_v24 = vpop.f32.mrf.mxu2 }
  0xb6   : > { %3362 = vst [vmem:[#allocation5_spill] sm:$0xff] %v2450_v24  ;;  %v2465_v31 = vpop.f32.mrf.mxu0 }
  0xb7   : > { %3364 = vst [vmem:[#allocation7_spill] sm:$0xff] %v2465_v31  ;;  %v873_v60 = vmul.f32 %v2465_v31, %v2465_v31  ;;  %v766_v10 = vadd.f32 %v2465_v31, %v2441_v19 }
  0xb8   : > { %v2452_v26 = vpop.f32.mrf.mxu1 }
  0xb9   : > { %v958_v11 = vadd.f32 %v873_v60, %v872_v59 }
  0xbc   : > { %v2456_v29 = vpop.f32.mrf.mxu3 }
  0xbd   : > { %v2458_v0 = vpop.f32.mrf.mxu2 }
  0xbe   : > { %v2477_v37 = vpop.f32.mrf.mxu0 }
  0xbf   : > { %v867_v58 = vmul.f32 %v2477_v37, %v2477_v37  ;;  %v757_v48 = vadd.f32 %v756_v55, %v2477_v37  ;;  %v879_v55 = vmul.f32 %v2428_v18, %v2428_v18 }
  0xc0   : > { %v2460_v30 = vpop.f32.mrf.mxu1 }
  0xc1   : > { %3363 = vst [vmem:[#allocation6_spill] sm:$0xff] %v2460_v30  ;;  %1842 = vmatmul.msk.bf16.gmra.mxu3 %vm464_vm0, %v1868_v5  ;;  %v950_v63 = vadd.f32 %v949_v57, %v867_v58 }
  0xc2   : > { %1860 = vmatmul.msk.bf16.gmra.mxu2 %vm464_vm0, %v1868_v5 }
  0xc3   : > { %1854 = vmatmul.msk.bf16.gmra.mxu1 %vm464_vm0, %v1868_v5 }
  0xc4   : > { %v2467_v32 = vpop.f32.mrf.mxu3 }
  0xc5   : > { %3365 = vst [vmem:[#allocation8_spill] sm:$0xff] %v2467_v32  ;;  %v2469_v33 = vpop.f32.mrf.mxu2 }
  0xc6   : > { %3366 = vst [vmem:[#allocation9_spill] sm:$0xff] %v2469_v33  ;;  %v2485_v39 = vpop.f32.mrf.mxu0 }
  0xc7   : > { %3372 = vst [vmem:[#allocation15_spill] sm:$0xff] %v2485_v39  ;;  %v874_v12 = vmul.f32 %v2485_v39, %v2485_v39 }
  0xc8   : > { %v2471_v34 = vpop.f32.mrf.mxu1 }
  0xc9   : > { %3367 = vst [vmem:[#allocation10_spill] sm:$0xff] %v2471_v34  ;;  %v959_v59 = vadd.f32 %v958_v11, %v874_v12  ;;  %v881_v11 = vmul.f32 %v2431_v15, %v2431_v15 }
  0xcc   : > { %v2473_v35 = vpop.f32.mrf.mxu3 }
  0xcd   : > { %3368 = vst [vmem:[#allocation11_spill] sm:$0xff] %v2473_v35  ;;  %v2475_v36 = vpop.f32.mrf.mxu2 }
  0xcf   : > { %v2495_v45 = vpop.f32.mrf.mxu0 }
  0xd0   : > { %v2479_v21 = vpop.f32.mrf.mxu1  ;;  %v869_v4 = vmul.f32 %v2495_v45, %v2495_v45 }
  0xd1   : > { %3369 = vst [vmem:[#allocation12_spill] sm:$0xff] %v2479_v21 }
  0xd4   : > { %v2481_v38 = vpop.f32.mrf.mxu3 }
  0xd5   : > { %3370 = vst [vmem:[#allocation13_spill] sm:$0xff] %v2481_v38  ;;  %v2483_v27 = vpop.f32.mrf.mxu2 }
  0xd6   : > { %3371 = vst [vmem:[#allocation14_spill] sm:$0xff] %v2483_v27 }
  0xd7   : > { %v2503_v50 = vpop.f32.mrf.mxu0 }
  0xd8   : > { %v2487_v40 = vpop.f32.mrf.mxu1  ;;  %3380 = vst [vmem:[#allocation23_spill] sm:$0xff] %v2503_v50 }
  0xd9   : > { %3373 = vst [vmem:[#allocation16_spill] sm:$0xff] %v2487_v40 }
  0xdc   : > { %v2489_v41 = vpop.f32.mrf.mxu3 }
  0xdd   : > { %3374 = vst [vmem:[#allocation17_spill] sm:$0xff] %v2489_v41  ;;  %v2491_v42 = vpop.f32.mrf.mxu2 }
  0xde   : > { %3375 = vst [vmem:[#allocation18_spill] sm:$0xff] %v2491_v42 }
  0xdf   : > { %v2526_v62 = vpop.f32.mrf.mxu0 }
  0xe0   : > { %v2493_v44 = vpop.f32.mrf.mxu1 }
  0xe1   : > { %3376 = vst [vmem:[#allocation19_spill] sm:$0xff] %v2493_v44 }
  0xe4   : > { %v2497_v46 = vpop.f32.mrf.mxu3 }
  0xe5   : > { %3377 = vst [vmem:[#allocation20_spill] sm:$0xff] %v2497_v46  ;;  %v2499_v47 = vpop.f32.mrf.mxu2 }
  0xe6   : > { %3378 = vst [vmem:[#allocation21_spill] sm:$0xff] %v2499_v47 }
  0xe8   : > { %v2501_v49 = vpop.f32.mrf.mxu1 }
  0xe9   : > { %3379 = vst [vmem:[#allocation22_spill] sm:$0xff] %v2501_v49 }
  0xec   : > { %v2505_v51 = vpop.f32.mrf.mxu3 }
  0xed   : > { %3381 = vst [vmem:[#allocation24_spill] sm:$0xff] %v2505_v51  ;;  %v2511_v54 = vpop.f32.mrf.mxu2 }
  0xee   : > { %3382 = vst [vmem:[#allocation25_spill] sm:$0xff] %v2511_v54 }
  0xf0   : > { %v2515_v56 = vpop.f32.mrf.mxu1 }
  0xf1   : > { %v870_v14 = vmul.f32 %v2515_v56, %v2515_v56 }
  0xf4   : > { %v2524_v61 = vpop.f32.mrf.mxu3 }
  0xf5   : > { %v758_v1 = vadd.f32 %v757_v48, %v2524_v61  ;;  %v868_v2 = vmul.f32 %v2524_v61, %v2524_v61  ;;  %v2531_v3 = vpop.f32.mrf.mxu2  ;;  %v767_v48 = vadd.f32 %v766_v10, %v2485_v39  ;;  %v967_v10 = vadd.f32 %v880_v53, %v879_v55 }
  0xf6   : > { %v762_v9 = vsel %vm761_vm1, %v2531_v3, 0.0  ;;  %v871_v57 = vmul.f32 %v2531_v3, %v2531_v3  ;;  %v886_v53 = vmul.f32 %v2437_v22, %v2437_v22 }
  0xf7   : > { %v951_v6 = vadd.f32 %v950_v63, %v868_v2  ;;  %v759_v7 = vadd.f32 %v758_v1, %v2495_v45  ;;  %v775_v1 = vadd.f32 %v2420_v25, %v2428_v18  ;;  %v2562_v2 = vpop.f32.mrf.mxu0 }
  0xf8   : > { %v2536_v8 = vpop.f32.mrf.mxu1 }
  0xf9   : > { %3383 = vst [vmem:[#allocation26_spill] sm:$0xff] %v2536_v8  ;;  %v760_v13 = vadd.f32 %v759_v7, %v2515_v56  ;;  %v952_v52 = vadd.f32 %v951_v6, %v869_v4  ;;  %v876_v4 = vmul.f32 %v2503_v50, %v2503_v50  ;;  %v877_v39 = vmul.f32 %v2536_v8, %v2536_v8 }
  0xfa   : > { %v776_v19 = vadd.f32 %v775_v1, %v2431_v15 }
  0xfb   : > { %v763_v5 = vadd.f32 %v762_v9, %v760_v13  ;;  %v953_v9 = vadd.f32 %v952_v52, %v870_v14  ;;  %v954_v13 = vsel %vm761_vm1, %v871_v57, 0.0  ;;  %v968_v52 = vadd.f32 %v967_v10, %v881_v11 }
  0xfc   : > { %v2553_v58 = vpop.f32.mrf.mxu3 }
  0xfd   : > { %3384 = vst [vmem:[#allocation27_spill] sm:$0xff] %v2553_v58  ;;  %v875_v60 = vmul.f32 %v2553_v58, %v2553_v58  ;;  %v2558_v63 = vpop.f32.mrf.mxu2  ;;  %764 = vadd.xlane.f32.xlu0 %v763_v5  ;;  %v768_v6 = vadd.f32 %v767_v48, %v2553_v58  ;;  %v955_v48 = vadd.f32 %v954_v13, %v953_v9 }
  0xfe   : > { %3385 = vst [vmem:[#allocation28_spill] sm:$0xff] %v2558_v63  ;;  %v878_v5 = vmul.f32 %v2558_v63, %v2558_v63 }
  0xff   : > { %v960_v7 = vadd.f32 %v959_v59, %v875_v60  ;;  %v769_v14 = vadd.f32 %v768_v6, %v2503_v50  ;;  %v883_v60 = vmul.f32 %v2526_v62, %v2526_v62  ;;  %v784_v6 = vadd.f32 %v2435_v17, %v2437_v22 }
 0x100   : > { %v2569_v12 = vpop.f32.mrf.mxu1  ;;  %v963_v57 = vsel %vm761_vm1, %v878_v5, 0.0 }
 0x101   : > { %3386 = vst [vmem:[#allocation29_spill] sm:$0xff] %v2569_v12  ;;  %v961_v31 = vadd.f32 %v960_v7, %v876_v4  ;;  %v884_v9 = vmul.f32 %v2569_v12, %v2569_v12  ;;  %v770_v10 = vadd.f32 %v769_v14, %v2536_v8 }
 0x103   : > { %v962_v59 = vadd.f32 %v961_v31, %v877_v39  ;;  %v887_v39 = vmul.f32 %v2435_v17, %v2435_v17 }
 0x104   : > { %v2580_v55 = vpop.f32.mrf.mxu3 }
 0x105   : > { %v777_v58 = vadd.f32 %v776_v19, %v2580_v55  ;;  %v882_v1 = vmul.f32 %v2580_v55, %v2580_v55  ;;  %v2588_v4 = vpop.f32.mrf.mxu2  ;;  %956 = vadd.xlane.f32.xlu0 %v955_v48  ;;  %v964_v31 = vadd.f32 %v963_v57, %v962_v59  ;;  %v976_v13 = vadd.f32 %v887_v39, %v886_v53  ;;  %v2602_v48 = vpop.f32.mrf.mxu0 }
 0x106   : > { %3387 = vst [vmem:[#allocation30_spill] sm:$0xff] %v2588_v4  ;;  %v885_v7 = vmul.f32 %v2588_v4, %v2588_v4  ;;  %v888_v59 = vmul.f32 %v2439_v43, %v2439_v43  ;;  %v894_v57 = vmul.f32 %v2443_v20, %v2443_v20  ;;  %v780_v53 = vsel %vm761_vm1, %v2588_v4, 0.0 }
 0x107   : > { %v969_v19 = vadd.f32 %v968_v52, %v882_v1  ;;  %965 = vadd.xlane.f32.xlu1 %v964_v31  ;;  %v778_v11 = vadd.f32 %v777_v58, %v2526_v62  ;;  %v893_v52 = vmul.f32 %v2448_v23, %v2448_v23  ;;  %v771_v58 = vsel %vm761_vm1, %v2558_v63, 0.0 }
 0x108   : > { %v2600_v5 = vpop.f32.mrf.mxu1  ;;  %v972_v14 = vsel %vm761_vm1, %v885_v7, 0.0  ;;  %v785_v1 = vadd.f32 %v784_v6, %v2439_v43  ;;  %v772_v31 = vadd.f32 %v771_v58, %v770_v10  ;;  %v977_v8 = vadd.f32 %v976_v13, %v888_v59 }
 0x109   : > { %v970_v50 = vadd.f32 %v969_v19, %v883_v60  ;;  %v779_v17 = vadd.f32 %v778_v11, %v2569_v12  ;;  %v793_v4 = vadd.f32 %v2443_v20, %v2448_v23  ;;  %v985_v12 = vadd.f32 %v894_v57, %v893_v52 }
 0x10a   : > { %v890_v6 = vmul.f32 %v2562_v2, %v2562_v2 }
 0x10b   : > { %v971_v39 = vadd.f32 %v970_v50, %v884_v9  ;;  %v781_v7 = vadd.f32 %v780_v53, %v779_v17  ;;  %v895_v50 = vmul.f32 %v2450_v24, %v2450_v24  ;;  %v891_v17 = vmul.f32 %v2600_v5, %v2600_v5 }
 0x10c   : > { %v2617_v22 = vpop.f32.mrf.mxu3  ;;  %v900_v53 = vmul.f32 %v2456_v29, %v2456_v29 }
 0x10d   : > { %v786_v60 = vadd.f32 %v785_v1, %v2617_v22  ;;  %v889_v19 = vmul.f32 %v2617_v22, %v2617_v22  ;;  %v2622_v11 = vpop.f32.mrf.mxu2  ;;  %773 = vadd.xlane.f32.xlu0 %v772_v31  ;;  %v973_v63 = vadd.f32 %v972_v14, %v971_v39  ;;  %v2638_v58 = vpop.f32.mrf.mxu0  ;;  %v794_v14 = vadd.f32 %v793_v4, %v2450_v24 }
 0x10e   : > { %v892_v13 = vmul.f32 %v2622_v11, %v2622_v11  ;;  %v897_v1 = vmul.f32 %v2602_v48, %v2602_v48 }
 0x10f   : > { %v978_v9 = vadd.f32 %v977_v8, %v889_v19  ;;  %974 = vadd.xlane.f32.xlu2 %v973_v63  ;;  %782 = vadd.xlane.f32.xlu1 %v781_v7  ;;  %v787_v10 = vadd.f32 %v786_v60, %v2562_v2  ;;  %v986_v8 = vadd.f32 %v985_v12, %v895_v50  ;;  %v789_v60 = vsel %vm761_vm1, %v2622_v11, 0.0 }
 0x110   : > { %v2633_v59 = vpop.f32.mrf.mxu1  ;;  %v981_v39 = vsel %vm761_vm1, %v892_v13, 0.0 }
 0x111   : > { %3388 = vst [vmem:[#allocation31_spill] sm:$0xff] %v2633_v59  ;;  %v979_v57 = vadd.f32 %v978_v9, %v890_v6  ;;  %v788_v52 = vadd.f32 %v787_v10, %v2600_v5  ;;  %v901_v6 = vmul.f32 %v2452_v26, %v2452_v26  ;;  %v802_v9 = vadd.f32 %v2452_v26, %v2456_v29 }
 0x112   : > { %v898_v13 = vmul.f32 %v2633_v59, %v2633_v59 }
 0x113   : > { %v980_v63 = vadd.f32 %v979_v57, %v891_v17  ;;  %v790_v50 = vadd.f32 %v789_v60, %v788_v52  ;;  %v803_v24 = vadd.f32 %v802_v9, %v2458_v0 }
 0x114   : > { %v2645_v31 = vpop.f32.mrf.mxu3 }
 0x115   : > { %3389 = vst [vmem:[#allocation32_spill] sm:$0xff] %v2645_v31  ;;  %v795_v19 = vadd.f32 %v794_v14, %v2645_v31  ;;  %v896_v4 = vmul.f32 %v2645_v31, %v2645_v31  ;;  %v2653_v12 = vpop.f32.mrf.mxu2  ;;  %v982_v7 = vadd.f32 %v981_v39, %v980_v63  ;;  %v994_v63 = vadd.f32 %v901_v6, %v900_v53  ;;  %v2679_v53 = vpop.f32.mrf.mxu0 }
 0x116   : > { %3390 = vst [vmem:[#allocation33_spill] sm:$0xff] %v2653_v12  ;;  %v899_v10 = vmul.f32 %v2653_v12, %v2653_v12  ;;  %v798_v52 = vsel %vm761_vm1, %v2653_v12, 0.0 }
 0x117   : > { %v987_v17 = vadd.f32 %v986_v8, %v896_v4  ;;  %983 = vadd.xlane.f32.xlu0 %v982_v7  ;;  %791 = vadd.xlane.f32.xlu1 %v790_v50  ;;  %v796_v57 = vadd.f32 %v795_v19, %v2602_v48  ;;  %v902_v8 = vmul.f32 %v2458_v0, %v2458_v0 }
 0x118   : > { %v2664_v14 = vpop.f32.mrf.mxu1  ;;  %v990_v31 = vsel %vm761_vm1, %v899_v10, 0.0  ;;  %v908_v19 = vmul.f32 %v2460_v30, %v2460_v30  ;;  %v907_v50 = vmul.f32 %v2467_v32, %v2467_v32  ;;  %3391 = vst [vmem:[#allocation34_spill] sm:$0xff] %v2679_v53 }
 0x119   : > { %v797_v39 = vadd.f32 %v796_v57, %v2633_v59  ;;  %v988_v60 = vadd.f32 %v987_v17, %v897_v1  ;;  %v995_v1 = vadd.f32 %v994_v63, %v902_v8  ;;  %v811_v17 = vadd.f32 %v2460_v30, %v2467_v32 }
 0x11a   : > { %v909_v63 = vmul.f32 %v2469_v33, %v2469_v33 }
 0x11b   : > { %v799_v4 = vadd.f32 %v798_v52, %v797_v39  ;;  %v989_v7 = vadd.f32 %v988_v60, %v898_v13  ;;  %v1003_v39 = vadd.f32 %v908_v19, %v907_v50  ;;  %v914_v19 = vmul.f32 %v2473_v35, %v2473_v35 }
 0x11c   : > { %v2677_v12 = vpop.f32.mrf.mxu3  ;;  %v905_v50 = vmul.f32 %v2664_v14, %v2664_v14 }
 0x11d   : > { %v804_v6 = vadd.f32 %v803_v24, %v2677_v12  ;;  %v903_v9 = vmul.f32 %v2677_v12, %v2677_v12  ;;  %v2684_v10 = vpop.f32.mrf.mxu2  ;;  %800 = vadd.xlane.f32.xlu2 %v799_v4  ;;  %v991_v13 = vadd.f32 %v990_v31, %v989_v7  ;;  %v904_v24 = vmul.f32 %v2638_v58, %v2638_v58 }
 0x11e   : > { %v807_v31 = vsel %vm761_vm1, %v2684_v10, 0.0  ;;  %v812_v4 = vadd.f32 %v811_v17, %v2469_v33  ;;  %v915_v17 = vmul.f32 %v2471_v34, %v2471_v34 }
 0x11f   : > { %v996_v57 = vadd.f32 %v995_v1, %v903_v9  ;;  %992 = vadd.xlane.f32.xlu1 %v991_v13  ;;  %v805_v52 = vadd.f32 %v804_v6, %v2638_v58  ;;  %v1004_v9 = vadd.f32 %v1003_v39, %v909_v63  ;;  %v906_v39 = vmul.f32 %v2684_v10, %v2684_v10  ;;  %v2716_v63 = vpop.f32.mrf.mxu0 }
 0x120   : > { %v2691_v60 = vpop.f32.mrf.mxu1  ;;  %3395 = vst [vmem:[#allocation38_spill] sm:$0xff] %v2716_v63  ;;  %v1012_v33 = vadd.f32 %v915_v17, %v914_v19  ;;  %v921_v19 = vmul.f32 %v2481_v38, %v2481_v38 }
 0x121   : > { %3392 = vst [vmem:[#allocation35_spill] sm:$0xff] %v2691_v60  ;;  %v806_v8 = vadd.f32 %v805_v52, %v2664_v14  ;;  %v997_v1 = vadd.f32 %v996_v57, %v904_v24  ;;  %v820_v57 = vadd.f32 %v2471_v34, %v2473_v35  ;;  %v911_v24 = vmul.f32 %v2679_v53, %v2679_v53 }
 0x122   : > { %v916_v35 = vmul.f32 %v2475_v36, %v2475_v36  ;;  %v999_v59 = vsel %vm761_vm1, %v906_v39, 0.0 }
 0x123   : > { %v808_v7 = vadd.f32 %v807_v31, %v806_v8  ;;  %v998_v31 = vadd.f32 %v997_v1, %v905_v50  ;;  %v821_v34 = vadd.f32 %v820_v57, %v2475_v36  ;;  %v912_v1 = vmul.f32 %v2691_v60, %v2691_v60 }
 0x124   : > { %v2699_v6 = vpop.f32.mrf.mxu3 }
 0x125   : > { %3393 = vst [vmem:[#allocation36_spill] sm:$0xff] %v2699_v6  ;;  %v813_v13 = vadd.f32 %v812_v4, %v2699_v6  ;;  %v910_v52 = vmul.f32 %v2699_v6, %v2699_v6  ;;  %v2708_v30 = vpop.f32.mrf.mxu2  ;;  %809 = vadd.xlane.f32.xlu2 %v808_v7 }
 0x126   : > { %3394 = vst [vmem:[#allocation37_spill] sm:$0xff] %v2708_v30  ;;  %v816_v7 = vsel %vm761_vm1, %v2708_v30, 0.0  ;;  %v913_v17 = vmul.f32 %v2708_v30, %v2708_v30  ;;  %v918_v30 = vmul.f32 %v2716_v63, %v2716_v63 }
 0x127   : > { %v1005_v8 = vadd.f32 %v1004_v9, %v910_v52  ;;  %v814_v4 = vadd.f32 %v813_v13, %v2679_v53  ;;  %v1000_v9 = vadd.f32 %v999_v59, %v998_v31  ;;  %v922_v52 = vmul.f32 %v2479_v21, %v2479_v21 }
 0x128   : > { %v2721_v6 = vpop.f32.mrf.mxu1 }
 0x129   : > { %3396 = vst [vmem:[#allocation39_spill] sm:$0xff] %v2721_v6  ;;  %v815_v32 = vadd.f32 %v814_v4, %v2691_v60  ;;  %v1006_v13 = vadd.f32 %v1005_v8, %v911_v24  ;;  %v1013_v4 = vadd.f32 %v1012_v33, %v916_v35  ;;  %v923_v33 = vmul.f32 %v2483_v27, %v2483_v27  ;;  %v2750_v35 = vpop.f32.mrf.mxu0 }
 0x12a   : > { %3398 = vst [vmem:[#allocation41_spill] sm:$0xff] %v2750_v35  ;;  %v919_v53 = vmul.f32 %v2721_v6, %v2721_v6 }
 0x12b   : > { %v817_v50 = vadd.f32 %v816_v7, %v815_v32  ;;  %v829_v32 = vadd.f32 %v2479_v21, %v2481_v38  ;;  %v1007_v8 = vadd.f32 %v1006_v13, %v912_v1  ;;  %v1021_v7 = vadd.f32 %v922_v52, %v921_v19 }
 0x12c   : > { %v2738_v57 = vpop.f32.mrf.mxu3 }
 0x12d   : > { %v822_v39 = vadd.f32 %v821_v34, %v2738_v57  ;;  %v917_v60 = vmul.f32 %v2738_v57, %v2738_v57  ;;  %v2743_v59 = vpop.f32.mrf.mxu2  ;;  %1001 = vadd.xlane.f32.xlu2 %v1000_v9  ;;  %818 = vadd.xlane.f32.xlu0 %v817_v50  ;;  %v1008_v34 = vsel %vm761_vm1, %v913_v17, 0.0  ;;  %v830_v1 = vadd.f32 %v829_v32, %v2483_v27 }
 0x12e   : > { %3397 = vst [vmem:[#allocation40_spill] sm:$0xff] %v2743_v59  ;;  %v1009_v13 = vadd.f32 %v1008_v34, %v1007_v8  ;;  %v838_v32 = vadd.f32 %v2487_v40, %v2489_v41  ;;  %v925_v8 = vmul.f32 %v2750_v35, %v2750_v35 }
 0x12f   : > { %v1014_v24 = vadd.f32 %v1013_v4, %v917_v60  ;;  %v823_v31 = vadd.f32 %v822_v39, %v2716_v63  ;;  %v825_v60 = vsel %vm761_vm1, %v2743_v59, 0.0  ;;  %v1022_v4 = vadd.f32 %v1021_v7, %v923_v33  ;;  %v2989_v63 = vld [vmem:[%s2895_s13 + $0x48] sm:$0xff] }
 0x130   : > { %v2756_v50 = vpop.f32.mrf.mxu1  ;;  %v928_v39 = vmul.f32 %v2489_v41, %v2489_v41 }
 0x131   : > { %v824_v9 = vadd.f32 %v823_v31, %v2721_v6  ;;  %3399 = vst [vmem:[#allocation42_spill] sm:$0xff] %v2756_v50  ;;  %v1015_v19 = vadd.f32 %v1014_v24, %v918_v30  ;;  %v929_v30 = vmul.f32 %v2487_v40, %v2487_v40  ;;  %v920_v24 = vmul.f32 %v2743_v59, %v2743_v59  ;;  %v2787_v40 = vpop.f32.mrf.mxu0 }
 0x132   : > { %3402 = vst [vmem:[#allocation45_spill] sm:$0xff] %v2787_v40 }
 0x133   : > { %v826_v52 = vadd.f32 %v825_v60, %v824_v9  ;;  %v1016_v33 = vadd.f32 %v1015_v19, %v919_v53  ;;  %v1030_v60 = vadd.f32 %v929_v30, %v928_v39  ;;  %v1017_v41 = vsel %vm761_vm1, %v920_v24, 0.0 }
 0x134   : > { %v2763_v17 = vpop.f32.mrf.mxu3  ;;  %v936_v39 = vmul.f32 %v2493_v44, %v2493_v44 }
 0x135   : > { %3400 = vst [vmem:[#allocation43_spill] sm:$0xff] %v2763_v17  ;;  %v831_v31 = vadd.f32 %v830_v1, %v2763_v17  ;;  %v924_v21 = vmul.f32 %v2763_v17, %v2763_v17  ;;  %v2770_v38 = vpop.f32.mrf.mxu2  ;;  %1010 = vadd.xlane.f32.xlu0 %v1009_v13  ;;  %827 = vadd.xlane.f32.xlu1 %v826_v52 }
 0x136   : > { %3401 = vst [vmem:[#allocation44_spill] sm:$0xff] %v2770_v38  ;;  %v834_v9 = vsel %vm761_vm1, %v2770_v38, 0.0  ;;  %v839_v13 = vadd.f32 %v838_v32, %v2491_v42  ;;  %v930_v52 = vmul.f32 %v2491_v42, %v2491_v42  ;;  %v1018_v53 = vadd.f32 %v1017_v41, %v1016_v33 }
 0x137   : > { %v1023_v7 = vadd.f32 %v1022_v4, %v924_v21  ;;  %v832_v34 = vadd.f32 %v831_v31, %v2750_v35  ;;  %v926_v21 = vmul.f32 %v2756_v50, %v2756_v50  ;;  %v935_v31 = vmul.f32 %v2497_v46, %v2497_v46  ;;  %v2948_v35 = vld [vmem:[%s2895_s13 + $0x28] sm:$0xff] }
 0x138   : > { %v927_v30 = vmul.f32 %v2770_v38, %v2770_v38  ;;  %v2798_v32 = vpop.f32.mrf.mxu1  ;;  %v1031_v24 = vadd.f32 %v1030_v60, %v930_v52  ;;  %v937_v60 = vmul.f32 %v2499_v47, %v2499_v47  ;;  %v932_v52 = vmul.f32 %v2787_v40, %v2787_v40 }
 0x139   : > { %v833_v1 = vadd.f32 %v832_v34, %v2756_v50  ;;  %v1024_v4 = vadd.f32 %v1023_v7, %v925_v8  ;;  %3403 = vst [vmem:[#allocation46_spill] sm:$0xff] %v2798_v32  ;;  %v847_v7 = vadd.f32 %v2493_v44, %v2497_v46  ;;  %v1039_v38 = vadd.f32 %v936_v39, %v935_v31  ;;  %v2908_v50 = vld [vmem:[%s2895_s13 + $0x8] sm:$0xff] }
 0x13b   : > { %v835_v19 = vadd.f32 %v834_v9, %v833_v1  ;;  %v1025_v9 = vadd.f32 %v1024_v4, %v926_v21  ;;  %v848_v21 = vadd.f32 %v847_v7, %v2499_v47  ;;  %v1040_v31 = vadd.f32 %v1039_v38, %v937_v60 }
 0x13c   : > { %v2800_v34 = vpop.f32.mrf.mxu3  ;;  %v943_v38 = vmul.f32 %v2501_v49, %v2501_v49  ;;  %v856_v7 = vadd.f32 %v2501_v49, %v2505_v51 }
 0x13d   : > { %3404 = vst [vmem:[#allocation47_spill] sm:$0xff] %v2800_v34  ;;  %v840_v42 = vadd.f32 %v839_v13, %v2800_v34  ;;  %v931_v41 = vmul.f32 %v2800_v34, %v2800_v34  ;;  %v2805_v8 = vpop.f32.mrf.mxu2  ;;  %1019 = vadd.xlane.f32.xlu1 %v1018_v53  ;;  %836 = vadd.xlane.f32.xlu2 %v835_v19  ;;  %v1026_v13 = vsel %vm761_vm1, %v927_v30, 0.0  ;;  %v2818_v19 = vpop.f32.mrf.mxu0 }
 0x13e   : > { %3405 = vst [vmem:[#allocation48_spill] sm:$0xff] %v2805_v8  ;;  %v843_v53 = vsel %vm761_vm1, %v2805_v8, 0.0  ;;  %v1027_v4 = vadd.f32 %v1026_v13, %v1025_v9  ;;  %v939_v13 = vmul.f32 %v2818_v19, %v2818_v19 }
 0x13f   : > { %v1032_v33 = vadd.f32 %v1031_v24, %v931_v41  ;;  %v841_v1 = vadd.f32 %v840_v42, %v2787_v40  ;;  %3406 = vst [vmem:[#allocation49_spill] sm:$0xff] %v2818_v19  ;;  %v942_v24 = vmul.f32 %v2505_v51, %v2505_v51 }
 0x140   : > { %v2825_v41 = vpop.f32.mrf.mxu1 }
 0x141   : > { %v842_v34 = vadd.f32 %v841_v1, %v2798_v32  ;;  %v1033_v39 = vadd.f32 %v1032_v33, %v932_v52  ;;  %3408 = vst [vmem:[#allocation51_spill] sm:$0xff] %v2825_v41  ;;  %v933_v1 = vmul.f32 %v2798_v32, %v2798_v32  ;;  %v934_v33 = vmul.f32 %v2805_v8, %v2805_v8 }
 0x142   : > { %v944_v32 = vmul.f32 %v2511_v54, %v2511_v54 }
 0x143   : > { %v844_v42 = vadd.f32 %v843_v53, %v842_v34  ;;  %v1034_v52 = vadd.f32 %v1033_v39, %v933_v1  ;;  %v1035_v8 = vsel %vm761_vm1, %v934_v33, 0.0 }
 0x144   : > { %v2823_v30 = vpop.f32.mrf.mxu3 }
 0x145   : > { %3407 = vst [vmem:[#allocation50_spill] sm:$0xff] %v2823_v30  ;;  %v849_v40 = vadd.f32 %v848_v21, %v2823_v30  ;;  %v938_v44 = vmul.f32 %v2823_v30, %v2823_v30  ;;  %1028 = vadd.xlane.f32.xlu2 %v1027_v4  ;;  %845 = vadd.xlane.f32.xlu0 %v844_v42  ;;  %v2832_v34 = vpop.f32.mrf.mxu2 }
 0x146   : > { %3409 = vst [vmem:[#allocation52_spill] sm:$0xff] %v2832_v34  ;;  %v852_v53 = vsel %vm761_vm1, %v2832_v34, 0.0  ;;  %v1048_v21 = vadd.f32 %v943_v38, %v942_v24  ;;  %v857_v42 = vadd.f32 %v856_v7, %v2511_v54  ;;  %v941_v39 = vmul.f32 %v2832_v34, %v2832_v34  ;;  %v2856_v24 = vpop.f32.mrf.mxu0 }
 0x147   : > { %v1041_v9 = vadd.f32 %v1040_v31, %v938_v44  ;;  %v850_v60 = vadd.f32 %v849_v40, %v2818_v19  ;;  %v940_v40 = vmul.f32 %v2825_v41, %v2825_v41  ;;  %v1036_v44 = vadd.f32 %v1035_v8, %v1034_v52  ;;  %3411 = vst [vmem:[#allocation54_spill] sm:$0xff] %v2856_v24 }
 0x148   : > { %v1049_v38 = vadd.f32 %v1048_v21, %v944_v32  ;;  %v2863_v8 = vpop.f32.mrf.mxu1  ;;  %v946_v52 = vmul.f32 %v2856_v24, %v2856_v24  ;;  %v1044_v21 = vsel %vm761_vm1, %v941_v39, 0.0 }
 0x149   : > { %v851_v4 = vadd.f32 %v850_v60, %v2825_v41  ;;  %v1042_v49 = vadd.f32 %v1041_v9, %v939_v13  ;;  %3413 = vst [vmem:[#allocation56_spill] sm:$0xff] %v2863_v8 }
 0x14b   : > { %v853_v31 = vadd.f32 %v852_v53, %v851_v4  ;;  %v1043_v53 = vadd.f32 %v1042_v49, %v940_v40 }
 0x14c   : > { %v2854_v1 = vpop.f32.mrf.mxu3 }
 0x14d   : > { %3410 = vst [vmem:[#allocation53_spill] sm:$0xff] %v2854_v1  ;;  %v858_v7 = vadd.f32 %v857_v42, %v2854_v1  ;;  %v945_v60 = vmul.f32 %v2854_v1, %v2854_v1  ;;  %1037 = vadd.xlane.f32.xlu0 %v1036_v44  ;;  %854 = vadd.xlane.f32.xlu1 %v853_v31  ;;  %v2861_v33 = vpop.f32.mrf.mxu2 }
 0x14e   : > { %3412 = vst [vmem:[#allocation55_spill] sm:$0xff] %v2861_v33  ;;  %v861_v32 = vsel %vm761_vm1, %v2861_v33, 0.0  ;;  %v947_v44 = vmul.f32 %v2863_v8, %v2863_v8  ;;  %v1045_v31 = vadd.f32 %v1044_v21, %v1043_v53 }
 0x14f   : > { %v1050_v9 = vadd.f32 %v1049_v38, %v945_v60  ;;  %v859_v13 = vadd.f32 %v858_v7, %v2856_v24  ;;  %v948_v38 = vmul.f32 %v2861_v33, %v2861_v33 }
 0x151   : > { %v860_v4 = vadd.f32 %v859_v13, %v2863_v8  ;;  %v1051_v42 = vadd.f32 %v1050_v9, %v946_v52  ;;  %v1053_v49 = vsel %vm761_vm1, %v948_v38, 0.0  ;;  %v1931_v13 = vmov 0  }
 0x152   : > { %1893 = vset.pattern.permute.xlu0 %v1931_v13  ;;  %1894 = vset.pattern.permute.xlu2 %v1931_v13 }
 0x153   : > { %v862_v1 = vadd.f32 %v861_v32, %v860_v4  ;;  %v1052_v7 = vadd.f32 %v1051_v42, %v947_v44  ;;  %1895 = vset.pattern.permute.xlu1 %v1931_v13 }
 0x155   : > { %1046 = vadd.xlane.f32.xlu1 %v1045_v31  ;;  %863 = vadd.xlane.f32.xlu2 %v862_v1  ;;  %v1054_v40 = vadd.f32 %v1053_v49, %v1052_v7 }
 0x15d   : > { %1055 = vadd.xlane.f32.xlu2 %v1054_v40 }
 0x170   : > { %v765_v60 = vpop.xlane.xlu0 %764 }
 0x171   : > { %v2877_v39 = vmul.f32 0.0012755102, %v765_v60 }
 0x173   : > { %v1081_v52 = vmul.f32 %v2877_v39, %v2877_v39 }
 0x178   : > { %v957_v9 = vpop.xlane.xlu0 %956 }
 0x179   : > { %v1069_v53 = vmul.f32 0.0012755102, %v957_v9 }
 0x17a   : > { %v966_v32 = vpop.xlane.xlu1 %965 }
 0x17b   : > { %v1093_v21 = vsub.f32 %v1069_v53, %v1081_v52  ;;  %v1070_v7 = vmul.f32 0.0012755102, %v966_v32 }
 0x17d   : > { %v1105_v1 = vmax.f32 %v1093_v21, 0.0 }
 0x17f   : > { %v1129_v4 = vadd.f32 0.001, %v1105_v1 }
 0x180   : > { %v774_v42 = vpop.xlane.xlu0 %773 }
 0x181   : > { %1899 = vrsqrt.f32 %v1129_v4  ;;  %v2881_v44 = vmul.f32 0.0012755102, %v774_v42  ;;  %vm1147_vm3 = vweird.f32 %v1129_v4 }
 0x182   : > { %v975_v31 = vpop.xlane.xlu2 %974  ;;  %v783_v38 = vpop.xlane.xlu1 %782 }
 0x183   : > { %v1082_v49 = vmul.f32 %v2881_v44, %v2881_v44  ;;  %v2885_v40 = vmul.f32 0.0012755102, %v783_v38  ;;  %v1071_v13 = vmul.f32 0.0012755102, %v975_v31 }
 0x185   : > { %v1094_v60 = vsub.f32 %v1070_v7, %v1082_v49  ;;  %v1083_v9 = vmul.f32 %v2885_v40, %v2885_v40 }
 0x187   : > { %v1900_v52 = vpop.eup %1899  ;;  %v1106_v53 = vmax.f32 %v1094_v60, 0.0  ;;  %v1095_v21 = vsub.f32 %v1071_v13, %v1083_v9  ;;  %v2900_v13 = vld [vmem:[%s2895_s13] sm:$0xff] }
 0x188   : > { %v1142_v1 = vmul.f32 %v1900_v52, %v1129_v4  ;;  %vm1148_vm2 = vweird.f32 %v1900_v52 }
 0x189   : > { %v1130_v42 = vadd.f32 0.001, %v1106_v53  ;;  %v1107_v33 = vmax.f32 %v1095_v21, 0.0  ;;  %vm1149_vm4 = vmor %vm1147_vm3, %vm1148_vm2 }
 0x18a   : > { %v1143_v8 = vmul.f32 %v1900_v52, %v1142_v1  ;;  %v792_v24 = vpop.xlane.xlu1 %791  ;;  %v984_v54 = vpop.xlane.xlu0 %983 }
 0x18b   : > { %1901 = vrsqrt.f32 %v1130_v42  ;;  %v1131_v32 = vadd.f32 0.001, %v1107_v33  ;;  %v2890_v38 = vmul.f32 0.0012755102, %v792_v24  ;;  %v1072_v7 = vmul.f32 0.0012755102, %v984_v54 }
 0x18c   : > { %v1144_v51 = vmul.f32 0.5, %v1143_v8  ;;  %vm1157_vm6 = vweird.f32 %v1130_v42 }
 0x18d   : > { %1903 = vrsqrt.f32 %v1131_v32  ;;  %v1084_v49 = vmul.f32 %v2890_v38, %v2890_v38  ;;  %vm1167_vm9 = vweird.f32 %v1131_v32 }
 0x18e   : > { %v1145_v31 = vsub.f32 1.5, %v1144_v51 }
 0x18f   : > { %v1096_v60 = vsub.f32 %v1072_v7, %v1084_v49 }
 0x190   : > { %v801_v33 = vpop.xlane.xlu2 %800  ;;  %v1146_v24 = vmul.f32 %v1900_v52, %v1145_v31 }
 0x191   : > { %v1902_v8 = vpop.eup %1901  ;;  %v2902_v9 = vmul.f32 0.0012755102, %v801_v33  ;;  %v1108_v21 = vmax.f32 %v1096_v60, 0.0 }
 0x192   : > { %v1152_v53 = vmul.f32 %v1902_v8, %v1130_v42  ;;  %v993_v1 = vpop.xlane.xlu1 %992  ;;  %v1150_v34 = vsel %vm1149_vm4, %v1900_v52, %v1146_v24  ;;  %vm1158_vm5 = vweird.f32 %v1902_v8  ;;  %v2916_v42 = vld [vmem:[%s2895_s13 + $0x10] sm:$0xff] }
 0x193   : > { %v1904_v51 = vpop.eup %1903  ;;  %v1085_v54 = vmul.f32 %v2902_v9, %v2902_v9  ;;  %v1073_v41 = vmul.f32 0.0012755102, %v993_v1  ;;  %v1261_v4 = vmul.f32 %v1150_v34, %v2900_v13  ;;  %v1132_v19 = vadd.f32 0.001, %v1108_v21  ;;  %vm1159_vm8 = vmor %vm1157_vm6, %vm1158_vm5 }
 0x194   : > { %v1153_v7 = vmul.f32 %v1902_v8, %v1152_v53  ;;  %v1162_v49 = vmul.f32 %v1904_v51, %v1131_v32  ;;  %vm1168_vm7 = vweird.f32 %v1904_v51 }
 0x195   : > { %v1097_v31 = vsub.f32 %v1073_v41, %v1085_v54  ;;  %1347 = vperm.xlu0 %1893, %v1261_v4   ;;  %1905 = vrsqrt.f32 %v1132_v19  ;;  %v1273_v41 = vmul.f32 %v1261_v4, %v2877_v39  ;;  %vm1169_vm10 = vmor %vm1167_vm9, %vm1168_vm7  ;;  %vm1177_vm12 = vweird.f32 %v1132_v19 }
 0x196   : > { %v1154_v33 = vmul.f32 0.5, %v1153_v7  ;;  %v1163_v30 = vmul.f32 %v1904_v51, %v1162_v49 }
 0x197   : > { %v1109_v47 = vmax.f32 %v1097_v31, 0.0 }
 0x198   : > { %v1155_v60 = vsub.f32 1.5, %v1154_v33  ;;  %v1164_v52 = vmul.f32 0.5, %v1163_v30  ;;  %v810_v24 = vpop.xlane.xlu2 %809 }
 0x199   : > { %v1133_v46 = vadd.f32 0.001, %v1109_v47  ;;  %v2912_v47 = vmul.f32 0.0012755102, %v810_v24 }
 0x19a   : > { %v1156_v1 = vmul.f32 %v1902_v8, %v1155_v60  ;;  %v1165_v34 = vsub.f32 1.5, %v1164_v52 }
 0x19b   : > { %1907 = vrsqrt.f32 %v1133_v46  ;;  %v1906_v53 = vpop.eup %1905  ;;  %v1086_v52 = vmul.f32 %v2912_v47, %v2912_v47  ;;  %vm1187_vm15 = vweird.f32 %v1133_v46 }
 0x19c   : > { %v1160_v21 = vsel %vm1159_vm8, %v1902_v8, %v1156_v1  ;;  %v1166_v54 = vmul.f32 %v1904_v51, %v1165_v34  ;;  %v1172_v30 = vmul.f32 %v1906_v53, %v1132_v19  ;;  %vm1178_vm11 = vweird.f32 %v1906_v53 }
 0x19d   : > { %v1262_v7 = vmul.f32 %v1160_v21, %v2908_v50  ;;  %1297 = vrot.lane.b32.xlu0 %v1273_v41, %s1932_s14  ;;  %v2925_v21 = vld [vmem:[%s2895_s13 + $0x18] sm:$0xff]  ;;  %vm1179_vm13 = vmor %vm1177_vm12, %vm1178_vm11 }
 0x19e   : > { %v1170_v49 = vsel %vm1169_vm10, %v1904_v51, %v1166_v54  ;;  %v1173_v33 = vmul.f32 %v1906_v53, %v1172_v30 }
 0x19f   : > { %v1274_v31 = vmul.f32 %v1262_v7, %v2881_v44  ;;  %1352 = vperm.xlu2 %1894, %v1262_v7   ;;  %v1263_v4 = vmul.f32 %v1170_v49, %v2916_v42 }
 0x1a0   : > { %v1002_v39 = vpop.xlane.xlu2 %1001  ;;  %v819_v8 = vpop.xlane.xlu0 %818  ;;  %v1174_v60 = vmul.f32 0.5, %v1173_v33 }
 0x1a1   : > { %v1908_v32 = vpop.eup %1907  ;;  %v1074_v24 = vmul.f32 0.0012755102, %v1002_v39  ;;  %1299 = vrot.lane.b32.xlu1 %v1274_v31, %s1932_s14  ;;  %v1275_v41 = vmul.f32 %v1263_v4, %v2885_v40  ;;  %v2927_v30 = vmul.f32 0.0012755102, %v819_v8 }
 0x1a2   : > { %v1182_v1 = vmul.f32 %v1908_v32, %v1133_v46  ;;  %v1175_v34 = vsub.f32 1.5, %v1174_v60  ;;  %vm1188_vm14 = vweird.f32 %v1908_v32 }
 0x1a3   : > { %v1098_v51 = vsub.f32 %v1074_v24, %v1086_v52  ;;  %v1087_v40 = vmul.f32 %v2927_v30, %v2927_v30  ;;  %vm1189_vm0 = vmor %vm1187_vm15, %vm1188_vm14 }
 0x1a4   : > { %v1183_v44 = vmul.f32 %v1908_v32, %v1182_v1  ;;  %v1176_v54 = vmul.f32 %v1906_v53, %v1175_v34  ;;  %v2936_v34 = vld [vmem:[%s2895_s13 + $0x20] sm:$0xff] }
 0x1a5   : > { %v1110_v7 = vmax.f32 %v1098_v51, 0.0 }
 0x1a6   : > { %v1184_v49 = vmul.f32 0.5, %v1183_v44  ;;  %v1180_v33 = vsel %vm1179_vm13, %v1906_v53, %v1176_v54 }
 0x1a7   : > { %v1134_v39 = vadd.f32 0.001, %v1110_v7  ;;  %1301 = vrot.lane.b32.xlu2 %v1275_v41, %s1932_s14  ;;  %v1264_v31 = vmul.f32 %v1180_v33, %v2925_v21 }
 0x1a8   : > { %v1185_v60 = vsub.f32 1.5, %v1184_v49  ;;  %v1011_v19 = vpop.xlane.xlu0 %1010  ;;  %v828_v52 = vpop.xlane.xlu1 %827 }
 0x1a9   : > { %1909 = vrsqrt.f32 %v1134_v39  ;;  %v1075_v24 = vmul.f32 0.0012755102, %v1011_v19  ;;  %1357 = vperm.xlu1 %1895, %v1263_v4   ;;  %v1276_v8 = vmul.f32 %v1264_v31, %v2890_v38  ;;  %v2938_v41 = vmul.f32 0.0012755102, %v828_v52 }
 0x1aa   : > { %v1186_v53 = vmul.f32 %v1908_v32, %v1185_v60  ;;  %vm1197_vm3 = vweird.f32 %v1134_v39 }
 0x1ab   : > { %v1099_v1 = vsub.f32 %v1075_v24, %v1087_v40  ;;  %1303 = vrot.lane.b32.xlu0 %v1276_v8, %s1932_s14  ;;  %v1088_v46 = vmul.f32 %v2938_v41, %v2938_v41 }
 0x1ac   : > { %v1190_v51 = vsel %vm1189_vm0, %v1908_v32, %v1186_v53 }
 0x1ad   : > { %v1111_v44 = vmax.f32 %v1099_v1, 0.0  ;;  %v1265_v49 = vmul.f32 %v1190_v51, %v2936_v34 }
 0x1af   : > { %v1910_v54 = vpop.eup %1909  ;;  %v1135_v7 = vadd.f32 0.001, %v1111_v44  ;;  %1362 = vperm.xlu2 %1894, %v1264_v31   ;;  %v1277_v31 = vmul.f32 %v1265_v49, %v2902_v9 }
 0x1b0   : > { %v1192_v4 = vmul.f32 %v1910_v54, %v1134_v39  ;;  %v1020_v33 = vpop.xlane.xlu1 %1019  ;;  %v837_v38 = vpop.xlane.xlu2 %836  ;;  %vm1198_vm2 = vweird.f32 %v1910_v54 }
 0x1b1   : > { %1911 = vrsqrt.f32 %v1135_v7  ;;  %v1076_v60 = vmul.f32 0.0012755102, %v1020_v33  ;;  %1367 = vperm.xlu1 %1895, %v1265_v49   ;;  %v2943_v24 = vmul.f32 0.0012755102, %v837_v38  ;;  %vm1199_vm4 = vmor %vm1197_vm3, %vm1198_vm2  ;;  %vm1207_vm6 = vweird.f32 %v1135_v7 }
 0x1b2   : > { %v1193_v19 = vmul.f32 %v1910_v54, %v1192_v4 }
 0x1b3   : > { %v1100_v32 = vsub.f32 %v1076_v60, %v1088_v46  ;;  %v1089_v38 = vmul.f32 %v2943_v24, %v2943_v24 }
 0x1b4   : > { %v1194_v40 = vmul.f32 0.5, %v1193_v19 }
 0x1b5   : > { %v1112_v52 = vmax.f32 %v1100_v32, 0.0 }
 0x1b6   : > { %v1195_v8 = vsub.f32 1.5, %v1194_v40 }
 0x1b7   : > { %v1912_v53 = vpop.eup %1911  ;;  %v1136_v1 = vadd.f32 0.001, %v1112_v52  ;;  %1305 = vrot.lane.b32.xlu2 %v1277_v31, %s1932_s14 }
 0x1b8   : > { %v1202_v51 = vmul.f32 %v1912_v53, %v1135_v7  ;;  %v1029_v44 = vpop.xlane.xlu2 %1028  ;;  %v846_v33 = vpop.xlane.xlu0 %845  ;;  %v1196_v4 = vmul.f32 %v1910_v54, %v1195_v8  ;;  %vm1208_vm5 = vweird.f32 %v1912_v53 }
 0x1b9   : > { %1913 = vrsqrt.f32 %v1136_v1  ;;  %v1077_v46 = vmul.f32 0.0012755102, %v1029_v44  ;;  %v2953_v40 = vmul.f32 0.0012755102, %v846_v33  ;;  %vm1209_vm7 = vmor %vm1207_vm6, %vm1208_vm5  ;;  %vm1217_vm9 = vweird.f32 %v1136_v1 }
 0x1ba   : > { %v1203_v9 = vmul.f32 %v1912_v53, %v1202_v51  ;;  %v1200_v49 = vsel %vm1199_vm4, %v1910_v54, %v1196_v4  ;;  %v2958_v4 = vld [vmem:[%s2895_s13 + $0x30] sm:$0xff] }
 0x1bb   : > { %v1101_v60 = vsub.f32 %v1077_v46, %v1089_v38  ;;  %v1266_v19 = vmul.f32 %v1200_v49, %v2948_v35  ;;  %v1090_v33 = vmul.f32 %v2953_v40, %v2953_v40 }
 0x1bc   : > { %v1204_v32 = vmul.f32 0.5, %v1203_v9 }
 0x1bd   : > { %v1113_v39 = vmax.f32 %v1101_v60, 0.0  ;;  %1372 = vperm.xlu0 %1893, %v1266_v19   ;;  %v1278_v52 = vmul.f32 %v1266_v19, %v2912_v47 }
 0x1be   : > { %v1205_v31 = vsub.f32 1.5, %v1204_v32 }
 0x1bf   : > { %v1914_v8 = vpop.eup %1913  ;;  %v1137_v17 = vadd.f32 0.001, %v1113_v39  ;;  %1307 = vrot.lane.b32.xlu1 %v1278_v52, %s1932_s14 }
 0x1c0   : > { %v1212_v51 = vmul.f32 %v1914_v8, %v1136_v1  ;;  %v1038_v54 = vpop.xlane.xlu0 %1037  ;;  %v855_v44 = vpop.xlane.xlu1 %854  ;;  %v1206_v38 = vmul.f32 %v1912_v53, %v1205_v31  ;;  %vm1218_vm8 = vweird.f32 %v1914_v8 }
 0x1c1   : > { %1915 = vrsqrt.f32 %v1137_v17  ;;  %v1078_v46 = vmul.f32 0.0012755102, %v1038_v54  ;;  %v2963_v32 = vmul.f32 0.0012755102, %v855_v44  ;;  %vm1219_vm10 = vmor %vm1217_vm9, %vm1218_vm8  ;;  %vm1227_vm12 = vweird.f32 %v1137_v17 }
 0x1c2   : > { %v1213_v47 = vmul.f32 %v1914_v8, %v1212_v51  ;;  %v1210_v9 = vsel %vm1209_vm7, %v1912_v53, %v1206_v38  ;;  %v2968_v38 = vld [vmem:[%s2895_s13 + $0x38] sm:$0xff] }
 0x1c3   : > { %v1102_v49 = vsub.f32 %v1078_v46, %v1090_v33  ;;  %v1267_v60 = vmul.f32 %v1210_v9, %v2958_v4  ;;  %v1091_v44 = vmul.f32 %v2963_v32, %v2963_v32 }
 0x1c4   : > { %v1214_v19 = vmul.f32 0.5, %v1213_v47 }
 0x1c5   : > { %v1114_v7 = vmax.f32 %v1102_v49, 0.0  ;;  %1377 = vperm.xlu2 %1894, %v1267_v60   ;;  %v1279_v39 = vmul.f32 %v1267_v60, %v2927_v30 }
 0x1c6   : > { %v1215_v52 = vsub.f32 1.5, %v1214_v19 }
 0x1c7   : > { %v1916_v31 = vpop.eup %1915  ;;  %v1138_v27 = vadd.f32 0.001, %v1114_v7  ;;  %1309 = vrot.lane.b32.xlu0 %v1279_v39, %s1932_s14 }
 0x1c8   : > { %v1222_v51 = vmul.f32 %v1916_v31, %v1137_v17  ;;  %v1047_v53 = vpop.xlane.xlu1 %1046  ;;  %v864_v54 = vpop.xlane.xlu2 %863  ;;  %v1216_v33 = vmul.f32 %v1914_v8, %v1215_v52  ;;  %vm1228_vm11 = vweird.f32 %v1916_v31 }
 0x1c9   : > { %1917 = vrsqrt.f32 %v1138_v27  ;;  %v1079_v46 = vmul.f32 0.0012755102, %v1047_v53  ;;  %v2975_v19 = vmul.f32 0.0012755102, %v864_v54  ;;  %v2981_v53 = vld [vmem:[%s2895_s13 + $0x40] sm:$0xff]  ;;  %vm1229_vm13 = vmor %vm1227_vm12, %vm1228_vm11  ;;  %vm1237_vm15 = vweird.f32 %v1138_v27 }
 0x1ca   : > { %v1223_v30 = vmul.f32 %v1916_v31, %v1222_v51  ;;  %v1220_v47 = vsel %vm1219_vm10, %v1914_v8, %v1216_v33 }
 0x1cb   : > { %v1103_v9 = vsub.f32 %v1079_v46, %v1091_v44  ;;  %v2973_v49 = vmul.f32 %v1220_v47, %v2968_v38  ;;  %v1092_v54 = vmul.f32 %v2975_v19, %v2975_v19 }
 0x1cc   : > { %v1224_v1 = vmul.f32 0.5, %v1223_v30 }
 0x1cd   : > { %v1115_v60 = vmax.f32 %v1103_v9, 0.0  ;;  %v1280_v7 = vmul.f32 %v2973_v49, %v2938_v41 }
 0x1ce   : > { %v1225_v39 = vsub.f32 1.5, %v1224_v1 }
 0x1cf   : > { %v1918_v52 = vpop.eup %1917  ;;  %v1139_v59 = vadd.f32 0.001, %v1115_v60  ;;  %1311 = vrot.lane.b32.xlu2 %v1280_v7, %s1932_s14 }
 0x1d0   : > { %v1232_v51 = vmul.f32 %v1918_v52, %v1138_v27  ;;  %v1056_v8 = vpop.xlane.xlu2 %1055  ;;  %v1226_v33 = vmul.f32 %v1916_v31, %v1225_v39  ;;  %vm1238_vm14 = vweird.f32 %v1918_v52 }
 0x1d1   : > { %1919 = vrsqrt.f32 %v1139_v59  ;;  %v1080_v44 = vmul.f32 0.0012755102, %v1056_v8  ;;  %vm1239_vm0 = vmor %vm1237_vm15, %vm1238_vm14  ;;  %vm1247_vm3 = vweird.f32 %v1139_v59 }
 0x1d2   : > { %v1233_v41 = vmul.f32 %v1918_v52, %v1232_v51  ;;  %v1230_v46 = vsel %vm1229_vm13, %v1916_v31, %v1226_v33 }
 0x1d3   : > { %v1104_v30 = vsub.f32 %v1080_v44, %v1092_v54  ;;  %v1269_v47 = vmul.f32 %v1230_v46, %v2981_v53  ;;  %v1127_v46 = vld [vmem:[%s2895_s13 + $0x50] sm:$0xff] }
 0x1d4   : > { %v1234_v9 = vmul.f32 0.5, %v1233_v41 }
 0x1d5   : > { %v1116_v1 = vmax.f32 %v1104_v30, 0.0  ;;  %v1281_v17 = vmul.f32 %v1269_v47, %v2943_v24 }
 0x1d6   : > { %v1235_v60 = vsub.f32 1.5, %v1234_v9 }
 0x1d7   : > { %v1920_v7 = vpop.eup %1919  ;;  %v1140_v39 = vadd.f32 0.001, %v1116_v1  ;;  %1313 = vrot.lane.b32.xlu1 %v1281_v17, %s1932_s14 }
 0x1d8   : > { %v1242_v6 = vmul.f32 %v1920_v7, %v1139_v59  ;;  %v1236_v51 = vmul.f32 %v1918_v52, %v1235_v60  ;;  %vm1248_vm2 = vweird.f32 %v1920_v7 }
 0x1d9   : > { %1921 = vrsqrt.f32 %v1140_v39  ;;  %vm1249_vm4 = vmor %vm1247_vm3, %vm1248_vm2  ;;  %vm1257_vm6 = vweird.f32 %v1140_v39 }
 0x1da   : > { %v1243_v31 = vmul.f32 %v1920_v7, %v1242_v6  ;;  %v1240_v8 = vsel %vm1239_vm0, %v1918_v52, %v1236_v51 }
 0x1db   : > { %v1270_v33 = vmul.f32 %v1240_v8, %v2989_v63 }
 0x1dc   : > { %v1244_v54 = vmul.f32 0.5, %v1243_v31 }
 0x1dd   : > { %v1282_v24 = vmul.f32 %v1270_v33, %v2953_v40  ;;  %v1128_v40 = vld [vmem:[%s2895_s13 + $0x58] sm:$0xff] }
 0x1de   : > { %v1245_v44 = vsub.f32 1.5, %v1244_v54 }
 0x1df   : > { %v1922_v41 = vpop.eup %1921  ;;  %1315 = vrot.lane.b32.xlu0 %v1282_v24, %s1932_s14 }
 0x1e0   : > { %v1252_v27 = vmul.f32 %v1922_v41, %v1140_v39  ;;  %v1246_v30 = vmul.f32 %v1920_v7, %v1245_v44  ;;  %vm1258_vm5 = vweird.f32 %v1922_v41 }
 0x1e1   : > { %vm1259_vm7 = vmor %vm1257_vm6, %vm1258_vm5 }
 0x1e2   : > { %v1253_v9 = vmul.f32 %v1922_v41, %v1252_v27  ;;  %v1250_v1 = vsel %vm1249_vm4, %v1920_v7, %v1246_v30  ;;  %v1933_v7 = vmov 1  }
 0x1e3   : > { %v1271_v6 = vmul.f32 %v1250_v1, %v1127_v46 }
 0x1e4   : > { %v1254_v52 = vmul.f32 0.5, %v1253_v9 }
 0x1e5   : > { %v1283_v17 = vmul.f32 %v1271_v6, %v2963_v32 }
 0x1e6   : > { %v1255_v60 = vsub.f32 1.5, %v1254_v52 }
 0x1e7   : > { %1387 = vperm.xlu0 %1893, %v1269_v47   ;;  %1317 = vrot.lane.b32.xlu2 %v1283_v17, %s1932_s14 }
 0x1e8   : > { %v1256_v51 = vmul.f32 %v1922_v41, %v1255_v60 }
 0x1ea   : > { %v1260_v59 = vsel %vm1259_vm7, %v1922_v41, %v1256_v51 }
 0x1eb   : > { %v1272_v31 = vmul.f32 %v1260_v59, %v1128_v40 }
 0x1ed   : > { %v1284_v8 = vmul.f32 %v1272_v31, %v2975_v19 }
 0x1ef   : > { %1392 = vperm.xlu2 %1894, %v1270_v33   ;;  %1402 = vperm.xlu0 %1893, %v1272_v31  }
 0x1f0   : > { %1319 = vrot.lane.b32.xlu1 %v1284_v8, %s1932_s14 }
 0x1f7   : > { %1898 = vset.pattern.permute.xlu0 %v1933_v7  ;;  %1896 = vset.pattern.permute.xlu2 %v1933_v7 }
 0x1f8   : > { %1382 = vperm.xlu1 %1895, %v2973_v49  }
 0x1f9   : > { %v3001_v32 = vpop.permute.xlu2 %1352 }
 0x200   : > { %1397 = vperm.xlu1 %1895, %v1271_v6  }
 0x201   : > { %v1302_v47 = vpop.permute.xlu2 %1301 }
 0x202   : > { %v1335_v39 = vsub.f32 %v2916_v42, %v1302_v47 }
 0x204   : > { %1501 = vperm.xlu0 %1898, %v1335_v39  }
 0x207   : > { %v1348_v54 = vpop.permute.xlu0 %1347 }
 0x208   : > { %1897 = vset.pattern.permute.xlu1 %v1933_v7 }
 0x209   : > { %v3004_v24 = vpop.permute.xlu2 %1362 }
 0x20f   : > { %v1298_v19 = vpop.permute.xlu0 %1297 }
 0x210   : > { %v1333_v33 = vsub.f32 %v2900_v13, %v1298_v19 }
 0x211   : > { %v1306_v49 = vpop.permute.xlu2 %1305 }
 0x212   : > { %1491 = vperm.xlu2 %1896, %v1333_v33   ;;  %v1337_v27 = vsub.f32 %v2936_v34, %v1306_v49  ;;  %v1407_v33 = vmul.f32 %v1348_v54, %v2477_v37  ;;  %v1410_v37 = vmul.f32 %v1348_v54, %v2515_v56 }
 0x213   : > { %v1300_v44 = vpop.permute.xlu1 %1299 }
 0x214   : > { %v1334_v41 = vsub.f32 %v2908_v50, %v1300_v44 }
 0x216   : > { %1496 = vperm.xlu1 %1897, %v1334_v41  }
 0x21b   : > { %v3009_v9 = vpop.permute.xlu1 %1357 }
 0x21c   : > { %v1420_v56 = vmul.f32 %v3009_v9, %v2420_v25 }
 0x21d   : > { %v1304_v30 = vpop.permute.xlu0 %1303 }
 0x21e   : > { %1511 = vperm.xlu1 %1897, %v1337_v27   ;;  %v1336_v42 = vsub.f32 %v2925_v21, %v1304_v30  ;;  %v1411_v27 = vmul.f32 %v1348_v54, %v2531_v3  ;;  %v1422_v3 = vmul.f32 %v3009_v9, %v2580_v55 }
 0x21f   : > { %v3012_v1 = vpop.permute.xlu2 %1377 }
 0x220   : > { %1506 = vperm.xlu2 %1896, %v1336_v42  }
 0x223   : > { %v3014_v6 = vpop.permute.xlu1 %1367 }
 0x229   : > { %v1312_v13 = vpop.permute.xlu2 %1311 }
 0x22a   : > { %v1340_v52 = vsub.f32 %v2968_v38, %v1312_v13  ;;  %v1421_v13 = vmul.f32 %v3009_v9, %v2431_v15 }
 0x22c   : > { %1526 = vperm.xlu0 %1898, %v1340_v52  }
 0x22f   : > { %v3017_v50 = vpop.permute.xlu0 %1372 }
 0x231   : > { %v1308_v17 = vpop.permute.xlu1 %1307 }
 0x232   : > { %v1338_v34 = vsub.f32 %v2948_v35, %v1308_v17  ;;  %v1423_v17 = vmul.f32 %v3009_v9, %v2526_v62  ;;  %v3417_v62 = vld [vmem:[#allocation2_spill] sm:$0xff] }
 0x234   : > { %1516 = vperm.xlu2 %1896, %v1338_v34  }
 0x239   : > { %v1310_v60 = vpop.permute.xlu0 %1309 }
 0x23a   : > { %v1339_v51 = vsub.f32 %v2958_v4, %v1310_v60  ;;  %v1405_v4 = vmul.f32 %v1348_v54, %v2433_v16  ;;  %v3414_v60 = vld [vmem:[#allocation29_spill] sm:$0xff] }
 0x23b   : > { %v1424_v15 = vmul.f32 %v3009_v9, %v3414_v60 }
 0x23c   : > { %1521 = vperm.xlu1 %1897, %v1339_v51  }
 0x241   : > { %v1318_v21 = vpop.permute.xlu2 %1317 }
 0x242   : > { %v1343_v59 = vsub.f32 %v1127_v46, %v1318_v21  ;;  %v1406_v46 = vmul.f32 %v1348_v54, %v2454_v28  ;;  %v3415_v21 = vld [vmem:[#allocation30_spill] sm:$0xff] }
 0x244   : > { %1541 = vperm.xlu0 %1898, %v1343_v59   ;;  %v1425_v59 = vmul.f32 %v3009_v9, %v3415_v21  ;;  %v1440_v21 = vmul.f32 %v3017_v50, %v2456_v29  ;;  %v1444_v29 = vmul.f32 %v3017_v50, %v2638_v58  ;;  %v1433_v58 = vmul.f32 %v3014_v6, %v2448_v23 }
 0x249   : > { %v1314_v31 = vpop.permute.xlu1 %1313  ;;  %v3023_v35 = vpop.permute.xlu2 %1392 }
 0x24a   : > { %v1341_v8 = vsub.f32 %v2981_v53, %v1314_v31  ;;  %v3416_v31 = vld [vmem:[#allocation3_spill] sm:$0xff] }
 0x24c   : > { %1531 = vperm.xlu2 %1896, %v1341_v8   ;;  %v1426_v8 = vmul.f32 %v3004_v24, %v3416_v31  ;;  %v1442_v31 = vmul.f32 %v3017_v50, %v2458_v0 }
 0x251   : > { %v1316_v38 = vpop.permute.xlu0 %1315 }
 0x252   : > { %v1342_v7 = vsub.f32 %v2989_v63, %v1316_v38  ;;  %v1408_v63 = vmul.f32 %v1348_v54, %v2524_v61 }
 0x254   : > { %1536 = vperm.xlu1 %1897, %v1342_v7   ;;  %v1427_v7 = vmul.f32 %v3004_v24, %v3417_v62 }
 0x259   : > { %v3025_v19 = vpop.permute.xlu0 %1387 }
 0x261   : > { %v3039_v41 = vpop.permute.xlu0 %1402 }
 0x262   : > { %v1320_v47 = vpop.permute.xlu1 %1319 }
 0x263   : > { %v1344_v39 = vsub.f32 %v1128_v40, %v1320_v47  ;;  %v1409_v40 = vmul.f32 %v1348_v54, %v2495_v45  ;;  %v1419_v45 = vmul.f32 %v3009_v9, %v2428_v18 }
 0x265   : > { %1546 = vperm.xlu2 %1896, %v1344_v39  }
 0x26a   : > { %v3058_v54 = vpop.permute.xlu1 %1382 }
 0x26c   : > { %v1492_v53 = vpop.permute.xlu2 %1491 }
 0x26d   : > { %v1549_v16 = vadd.f32 %v1492_v53, %v1405_v4  ;;  %v1550_v28 = vadd.f32 %v1492_v53, %v1406_v46  ;;  %v1551_v44 = vadd.f32 %v1492_v53, %v1407_v33  ;;  %v1552_v49 = vadd.f32 %v1492_v53, %v1408_v63 }
 0x26e   : > { %v1553_v30 = vadd.f32 %v1492_v53, %v1409_v40  ;;  %v1554_v61 = vadd.f32 %v1492_v53, %v1410_v37  ;;  %v1555_v42 = vadd.f32 %v1492_v53, %v1411_v27  ;;  %v1428_v4 = vmul.f32 %v3004_v24, %v2439_v43 }
 0x26f   : > { %1633 = vst [vmem:[%s3034_s18] sm:$0xff] %v1549_v16  ;;  %v1429_v46 = vmul.f32 %v3004_v24, %v2617_v22  ;;  %v1430_v63 = vmul.f32 %v3004_v24, %v2562_v2  ;;  %v1431_v43 = vmul.f32 %v3004_v24, %v2600_v5  ;;  %v1432_v22 = vmul.f32 %v3004_v24, %v2622_v11  ;;  %v3418_v5 = vld [vmem:[#allocation4_spill] sm:$0xff]  ;;  %v3420_v24 = vld [vmem:[#allocation15_spill] sm:$0xff] }
 0x270   : > { %1634 = vst [vmem:[%s3034_s18 + $0x8] sm:$0xff] %v1550_v28  ;;  %v1412_v37 = vmul.f32 %v3001_v32, %v3418_v5  ;;  %v1414_v27 = vmul.f32 %v3001_v32, %v3420_v24 }
 0x271   : > { %1635 = vst [vmem:[%s3034_s18 + $0x10] sm:$0xff] %v1551_v44 }
 0x272   : > { %1636 = vst [vmem:[%s3034_s18 + $0x18] sm:$0xff] %v1552_v49  ;;  %v3088_v16 = vpop.permute.xlu1 %1397  ;;  %v3419_v49 = vld [vmem:[#allocation7_spill] sm:$0xff] }
 0x273   : > { %1637 = vst [vmem:[%s3034_s18 + $0x20] sm:$0xff] %v1553_v30  ;;  %v1413_v11 = vmul.f32 %v3001_v32, %v3419_v49  ;;  %v3421_v30 = vld [vmem:[#allocation27_spill] sm:$0xff] }
 0x274   : > { %1638 = vst [vmem:[%s3034_s18 + $0x28] sm:$0xff] %v1554_v61  ;;  %v1415_v61 = vmul.f32 %v3001_v32, %v3421_v30 }
 0x275   : > { %1639 = vst.msk [vmem:[%s3034_s18 + $0x30] sm:$0xff] %vm761_vm1, %v1555_v42 }
 0x276   : > { %v1502_v52 = vpop.permute.xlu0 %1501 }
 0x277   : > { %v1563_v18 = vadd.f32 %v1502_v52, %v1419_v45  ;;  %v1564_v34 = vadd.f32 %v1502_v52, %v1420_v56  ;;  %v1565_v25 = vadd.f32 %v1502_v52, %v1421_v13  ;;  %v1566_v51 = vadd.f32 %v1502_v52, %v1422_v3  ;;  %v3422_v45 = vld [vmem:[#allocation23_spill] sm:$0xff] }
 0x278   : > { %v1567_v55 = vadd.f32 %v1502_v52, %v1423_v17  ;;  %v1568_v38 = vadd.f32 %v1502_v52, %v1424_v15  ;;  %v1569_v47 = vadd.f32 %v1502_v52, %v1425_v59  ;;  %v1416_v56 = vmul.f32 %v3001_v32, %v3422_v45  ;;  %v3423_v17 = vld [vmem:[#allocation26_spill] sm:$0xff] }
 0x279   : > { %1647 = vst [vmem:[%s3034_s18 + $0x70] sm:$0xff] %v1563_v18  ;;  %v1417_v18 = vmul.f32 %v3001_v32, %v3423_v17  ;;  %v1441_v59 = vmul.f32 %v3017_v50, %v2452_v26  ;;  %v3433_v17 = vld [vmem:[#allocation40_spill] sm:$0xff] }
 0x27a   : > { %1648 = vst [vmem:[%s3034_s18 + $0x78] sm:$0xff] %v1564_v34  ;;  %v1507_v39 = vpop.permute.xlu2 %1506 }
 0x27b   : > { %1649 = vst [vmem:[%s3034_s18 + $0x80] sm:$0xff] %v1565_v25  ;;  %v1570_v9 = vadd.f32 %v1507_v39, %v1426_v8  ;;  %v1571_v33 = vadd.f32 %v1507_v39, %v1427_v7  ;;  %v1572_v53 = vadd.f32 %v1507_v39, %v1428_v4  ;;  %v1573_v40 = vadd.f32 %v1507_v39, %v1429_v46  ;;  %v3424_v25 = vld [vmem:[#allocation28_spill] sm:$0xff]  ;;  %v3425_v46 = vld [vmem:[#allocation5_spill] sm:$0xff] }
 0x27c   : > { %1650 = vst [vmem:[%s3034_s18 + $0x88] sm:$0xff] %v1566_v51  ;;  %v1574_v28 = vadd.f32 %v1507_v39, %v1430_v63  ;;  %v1575_v44 = vadd.f32 %v1507_v39, %v1431_v43  ;;  %v1576_v2 = vadd.f32 %v1507_v39, %v1432_v22  ;;  %v1418_v60 = vmul.f32 %v3001_v32, %v3424_v25  ;;  %v3427_v43 = vld [vmem:[#allocation31_spill] sm:$0xff] }
 0x27d   : > { %1651 = vst [vmem:[%s3034_s18 + $0x90] sm:$0xff] %v1567_v55  ;;  %v1443_v8 = vmul.f32 %v3017_v50, %v2677_v12  ;;  %v1445_v7 = vmul.f32 %v3017_v50, %v2664_v14  ;;  %v1446_v12 = vmul.f32 %v3017_v50, %v2684_v10  ;;  %v1434_v14 = vmul.f32 %v3014_v6, %v2443_v20  ;;  %v3426_v50 = vld [vmem:[#allocation32_spill] sm:$0xff] }
 0x27e   : > { %1652 = vst [vmem:[%s3034_s18 + $0x98] sm:$0xff] %v1568_v38  ;;  %v1436_v63 = vmul.f32 %v3014_v6, %v3426_v50  ;;  %v3443_v50 = vld [vmem:[#allocation9_spill] sm:$0xff] }
 0x27f   : > { %1653 = vst.msk [vmem:[%s3034_s18 + $0xa0] sm:$0xff] %vm761_vm1, %v1569_v47 }
 0x280   : > { %1654 = vst [vmem:[%s3034_s18 + $0xa8] sm:$0xff] %v1570_v9 }
 0x281   : > { %1655 = vst [vmem:[%s3034_s18 + $0xb0] sm:$0xff] %v1571_v33  ;;  %v1435_v33 = vmul.f32 %v3014_v6, %v3425_v46 }
 0x282   : > { %1656 = vst [vmem:[%s3034_s18 + $0xb8] sm:$0xff] %v1572_v53  ;;  %v1437_v53 = vmul.f32 %v3014_v6, %v2602_v48  ;;  %v3429_v48 = vld [vmem:[#allocation11_spill] sm:$0xff] }
 0x283   : > { %1657 = vst [vmem:[%s3034_s18 + $0xc0] sm:$0xff] %v1573_v40  ;;  %v1438_v40 = vmul.f32 %v3014_v6, %v3427_v43  ;;  %v1454_v49 = vmul.f32 %v3058_v54, %v3429_v48 }
 0x284   : > { %1658 = vst [vmem:[%s3034_s18 + $0xc8] sm:$0xff] %v1574_v28  ;;  %v3428_v28 = vld [vmem:[#allocation33_spill] sm:$0xff] }
 0x285   : > { %1659 = vst [vmem:[%s3034_s18 + $0xd0] sm:$0xff] %v1575_v44  ;;  %v1439_v44 = vmul.f32 %v3014_v6, %v3428_v28  ;;  %v1457_v6 = vmul.f32 %v3058_v54, %v2738_v57  ;;  %v1460_v57 = vmul.f32 %v3058_v54, %v3433_v17 }
 0x286   : > { %1660 = vst.msk [vmem:[%s3034_s18 + $0xd8] sm:$0xff] %vm761_vm1, %v1576_v2 }
 0x288   : > { %v1497_v42 = vpop.permute.xlu1 %1496 }
 0x289   : > { %v1556_v13 = vadd.f32 %v1497_v42, %v1412_v37  ;;  %v1557_v3 = vadd.f32 %v1497_v42, %v1413_v11  ;;  %v1558_v52 = vadd.f32 %v1497_v42, %v1414_v27  ;;  %v1559_v34 = vadd.f32 %v1497_v42, %v1415_v61  ;;  %v3430_v11 = vld [vmem:[#allocation10_spill] sm:$0xff] }
 0x28a   : > { %v1560_v15 = vadd.f32 %v1497_v42, %v1416_v56  ;;  %v1561_v51 = vadd.f32 %v1497_v42, %v1417_v18  ;;  %v1562_v55 = vadd.f32 %v1497_v42, %v1418_v60  ;;  %v1455_v24 = vmul.f32 %v3058_v54, %v3430_v11  ;;  %v3431_v61 = vld [vmem:[#allocation38_spill] sm:$0xff]  ;;  %v3434_v60 = vld [vmem:[#allocation13_spill] sm:$0xff] }
 0x28b   : > { %1640 = vst [vmem:[%s3034_s18 + $0x38] sm:$0xff] %v1556_v13  ;;  %v1456_v27 = vmul.f32 %v3058_v54, %v2475_v36  ;;  %v1458_v42 = vmul.f32 %v3058_v54, %v3431_v61 }
 0x28c   : > { %1641 = vst [vmem:[%s3034_s18 + $0x40] sm:$0xff] %v1557_v3  ;;  %v3432_v3 = vld [vmem:[#allocation39_spill] sm:$0xff] }
 0x28d   : > { %1642 = vst [vmem:[%s3034_s18 + $0x48] sm:$0xff] %v1558_v52  ;;  %v1459_v36 = vmul.f32 %v3058_v54, %v3432_v3  ;;  %v3437_v54 = vld [vmem:[#allocation43_spill] sm:$0xff]  ;;  %v3452_v3 = vld [vmem:[#allocation49_spill] sm:$0xff] }
 0x28e   : > { %1643 = vst [vmem:[%s3034_s18 + $0x50] sm:$0xff] %v1559_v34  ;;  %v1517_v32 = vpop.permute.xlu2 %1516 }
 0x28f   : > { %1644 = vst [vmem:[%s3034_s18 + $0x58] sm:$0xff] %v1560_v15  ;;  %v1584_v38 = vadd.f32 %v1517_v32, %v1440_v21  ;;  %v1585_v62 = vadd.f32 %v1517_v32, %v1441_v59  ;;  %v1586_v26 = vadd.f32 %v1517_v32, %v1442_v31  ;;  %v1587_v0 = vadd.f32 %v1517_v32, %v1443_v8  ;;  %v3436_v59 = vld [vmem:[#allocation14_spill] sm:$0xff]  ;;  %v3438_v8 = vld [vmem:[#allocation41_spill] sm:$0xff] }
 0x290   : > { %1645 = vst [vmem:[%s3034_s18 + $0x60] sm:$0xff] %v1561_v51  ;;  %v1588_v47 = vadd.f32 %v1517_v32, %v1444_v29  ;;  %v1512_v39 = vpop.permute.xlu1 %1511  ;;  %v1589_v4 = vadd.f32 %v1517_v32, %v1445_v7  ;;  %v1590_v9 = vadd.f32 %v1517_v32, %v1446_v12  ;;  %v1461_v15 = vmul.f32 %v3025_v19, %v3434_v60  ;;  %v3435_v51 = vld [vmem:[#allocation12_spill] sm:$0xff]  ;;  %v3439_v7 = vld [vmem:[#allocation42_spill] sm:$0xff] }
 0x291   : > { %1646 = vst.msk [vmem:[%s3034_s18 + $0x68] sm:$0xff] %vm761_vm1, %v1562_v55  ;;  %v1577_v10 = vadd.f32 %v1512_v39, %v1433_v58  ;;  %v1578_v23 = vadd.f32 %v1512_v39, %v1434_v14  ;;  %v1579_v20 = vadd.f32 %v1512_v39, %v1435_v33  ;;  %v1580_v22 = vadd.f32 %v1512_v39, %v1436_v63  ;;  %v3442_v33 = vld [vmem:[#allocation6_spill] sm:$0xff]  ;;  %v3454_v60 = vld [vmem:[#allocation52_spill] sm:$0xff] }
 0x292   : > { %1668 = vst [vmem:[%s3034_s18 + $0x118] sm:$0xff] %v1584_v38  ;;  %v1581_v2 = vadd.f32 %v1512_v39, %v1437_v53  ;;  %v1582_v5 = vadd.f32 %v1512_v39, %v1438_v40  ;;  %v1583_v37 = vadd.f32 %v1512_v39, %v1439_v44  ;;  %v1462_v21 = vmul.f32 %v3025_v19, %v3435_v51  ;;  %v3446_v44 = vld [vmem:[#allocation35_spill] sm:$0xff] }
 0x293   : > { %1669 = vst [vmem:[%s3034_s18 + $0x120] sm:$0xff] %v1585_v62  ;;  %v1463_v55 = vmul.f32 %v3025_v19, %v3436_v59  ;;  %v1464_v31 = vmul.f32 %v3025_v19, %v3437_v54  ;;  %v1465_v38 = vmul.f32 %v3025_v19, %v3438_v8  ;;  %v1449_v63 = vmul.f32 %v3012_v1, %v3443_v50  ;;  %v3457_v8 = vld [vmem:[#allocation25_spill] sm:$0xff] }
 0x294   : > { %1670 = vst [vmem:[%s3034_s18 + $0x128] sm:$0xff] %v1586_v26  ;;  %v3462_v50 = vld [vmem:[#allocation17_spill] sm:$0xff] }
 0x295   : > { %1671 = vst [vmem:[%s3034_s18 + $0x130] sm:$0xff] %v1587_v0  ;;  %v1466_v0 = vmul.f32 %v3025_v19, %v3439_v7 }
 0x296   : > { %1672 = vst [vmem:[%s3034_s18 + $0x138] sm:$0xff] %v1588_v47  ;;  %v3440_v47 = vld [vmem:[#allocation44_spill] sm:$0xff] }
 0x297   : > { %1673 = vst [vmem:[%s3034_s18 + $0x140] sm:$0xff] %v1589_v4  ;;  %v1467_v39 = vmul.f32 %v3025_v19, %v3440_v47  ;;  %v3444_v19 = vld [vmem:[#allocation36_spill] sm:$0xff] }
 0x298   : > { %1674 = vst.msk [vmem:[%s3034_s18 + $0x148] sm:$0xff] %vm761_vm1, %v1590_v9  ;;  %v3441_v9 = vld [vmem:[#allocation8_spill] sm:$0xff] }
 0x299   : > { %1661 = vst [vmem:[%s3034_s18 + $0xe0] sm:$0xff] %v1577_v10  ;;  %v1447_v46 = vmul.f32 %v3012_v1, %v3441_v9  ;;  %v1448_v10 = vmul.f32 %v3012_v1, %v3442_v33 }
 0x29a   : > { %1662 = vst [vmem:[%s3034_s18 + $0xe8] sm:$0xff] %v1578_v23  ;;  %v1450_v23 = vmul.f32 %v3012_v1, %v3444_v19  ;;  %v3463_v19 = vld [vmem:[#allocation16_spill] sm:$0xff] }
 0x29b   : > { %1663 = vst [vmem:[%s3034_s18 + $0xf0] sm:$0xff] %v1579_v20  ;;  %v3445_v20 = vld [vmem:[#allocation34_spill] sm:$0xff] }
 0x29c   : > { %1664 = vst [vmem:[%s3034_s18 + $0xf8] sm:$0xff] %v1580_v22  ;;  %v1451_v43 = vmul.f32 %v3012_v1, %v3445_v20 }
 0x29d   : > { %1665 = vst [vmem:[%s3034_s18 + $0x100] sm:$0xff] %v1581_v2  ;;  %v1452_v2 = vmul.f32 %v3012_v1, %v3446_v44 }
 0x29e   : > { %1666 = vst [vmem:[%s3034_s18 + $0x108] sm:$0xff] %v1582_v5  ;;  %v1527_v30 = vpop.permute.xlu0 %1526 }
 0x29f   : > { %1667 = vst.msk [vmem:[%s3034_s18 + $0x110] sm:$0xff] %vm761_vm1, %v1583_v37  ;;  %v1598_v45 = vadd.f32 %v1527_v30, %v1454_v49  ;;  %v1599_v56 = vadd.f32 %v1527_v30, %v1455_v24  ;;  %v1600_v13 = vadd.f32 %v1527_v30, %v1456_v27  ;;  %v1601_v52 = vadd.f32 %v1527_v30, %v1457_v6  ;;  %v3447_v37 = vld [vmem:[#allocation37_spill] sm:$0xff]  ;;  %v3448_v27 = vld [vmem:[#allocation20_spill] sm:$0xff] }
 0x2a0   : > { %v1602_v18 = vadd.f32 %v1527_v30, %v1458_v42  ;;  %v1603_v34 = vadd.f32 %v1527_v30, %v1459_v36  ;;  %v1604_v25 = vadd.f32 %v1527_v30, %v1460_v57  ;;  %v1453_v48 = vmul.f32 %v3012_v1, %v3447_v37  ;;  %v3449_v30 = vld [vmem:[#allocation19_spill] sm:$0xff]  ;;  %v3450_v42 = vld [vmem:[#allocation21_spill] sm:$0xff]  ;;  %v3451_v1 = vld [vmem:[#allocation50_spill] sm:$0xff] }
 0x2a1   : > { %1682 = vst [vmem:[%s3034_s18 + $0x188] sm:$0xff] %v1598_v45  ;;  %v1475_v6 = vmul.f32 %v3088_v16, %v3448_v27  ;;  %v1476_v61 = vmul.f32 %v3088_v16, %v3449_v30  ;;  %v1477_v45 = vmul.f32 %v3088_v16, %v3450_v42  ;;  %v1479_v36 = vmul.f32 %v3088_v16, %v3452_v3  ;;  %v3467_v37 = vld [vmem:[#allocation46_spill] sm:$0xff] }
 0x2a2   : > { %1683 = vst [vmem:[%s3034_s18 + $0x190] sm:$0xff] %v1599_v56  ;;  %v1478_v56 = vmul.f32 %v3088_v16, %v3451_v1 }
 0x2a3   : > { %1684 = vst [vmem:[%s3034_s18 + $0x198] sm:$0xff] %v1600_v13 }
 0x2a4   : > { %1685 = vst [vmem:[%s3034_s18 + $0x1a0] sm:$0xff] %v1601_v52 }
 0x2a5   : > { %1686 = vst [vmem:[%s3034_s18 + $0x1a8] sm:$0xff] %v1602_v18  ;;  %v3453_v18 = vld [vmem:[#allocation51_spill] sm:$0xff] }
 0x2a6   : > { %1687 = vst [vmem:[%s3034_s18 + $0x1b0] sm:$0xff] %v1603_v34  ;;  %v1532_v32 = vpop.permute.xlu2 %1531  ;;  %v1480_v34 = vmul.f32 %v3088_v16, %v3453_v18 }
 0x2a7   : > { %1688 = vst.msk [vmem:[%s3034_s18 + $0x1b8] sm:$0xff] %vm761_vm1, %v1604_v25  ;;  %v1605_v62 = vadd.f32 %v1532_v32, %v1461_v15  ;;  %v1606_v29 = vadd.f32 %v1532_v32, %v1462_v21  ;;  %v1607_v26 = vadd.f32 %v1532_v32, %v1463_v55  ;;  %v1608_v12 = vadd.f32 %v1532_v32, %v1464_v31  ;;  %v3455_v55 = vld [vmem:[#allocation24_spill] sm:$0xff]  ;;  %v3456_v31 = vld [vmem:[#allocation22_spill] sm:$0xff] }
 0x2a8   : > { %v1609_v58 = vadd.f32 %v1532_v32, %v1465_v38  ;;  %v1610_v4 = vadd.f32 %v1532_v32, %v1466_v0  ;;  %v1611_v14 = vadd.f32 %v1532_v32, %v1467_v39  ;;  %v1481_v15 = vmul.f32 %v3088_v16, %v3454_v60  ;;  %v3458_v38 = vld [vmem:[#allocation53_spill] sm:$0xff]  ;;  %v3460_v39 = vld [vmem:[#allocation56_spill] sm:$0xff] }
 0x2a9   : > { %1689 = vst [vmem:[%s3034_s18 + $0x1c0] sm:$0xff] %v1605_v62  ;;  %v1482_v54 = vmul.f32 %v3039_v41, %v3455_v55  ;;  %v1483_v32 = vmul.f32 %v3039_v41, %v3456_v31  ;;  %v1484_v16 = vmul.f32 %v3039_v41, %v3457_v8  ;;  %v1485_v62 = vmul.f32 %v3039_v41, %v3458_v38 }
 0x2aa   : > { %1690 = vst [vmem:[%s3034_s18 + $0x1c8] sm:$0xff] %v1606_v29 }
 0x2ab   : > { %1691 = vst [vmem:[%s3034_s18 + $0x1d0] sm:$0xff] %v1607_v26  ;;  %v3459_v26 = vld [vmem:[#allocation54_spill] sm:$0xff] }
 0x2ac   : > { %1692 = vst [vmem:[%s3034_s18 + $0x1d8] sm:$0xff] %v1608_v12  ;;  %v1486_v7 = vmul.f32 %v3039_v41, %v3459_v26 }
 0x2ad   : > { %1693 = vst [vmem:[%s3034_s18 + $0x1e0] sm:$0xff] %v1609_v58  ;;  %v1487_v58 = vmul.f32 %v3039_v41, %v3460_v39 }
 0x2ae   : > { %1694 = vst [vmem:[%s3034_s18 + $0x1e8] sm:$0xff] %v1610_v4  ;;  %v1522_v53 = vpop.permute.xlu1 %1521 }
 0x2af   : > { %1695 = vst.msk [vmem:[%s3034_s18 + $0x1f0] sm:$0xff] %vm761_vm1, %v1611_v14  ;;  %v1591_v40 = vadd.f32 %v1522_v53, %v1447_v46  ;;  %v1592_v22 = vadd.f32 %v1522_v53, %v1448_v10  ;;  %v1593_v28 = vadd.f32 %v1522_v53, %v1449_v63  ;;  %v1594_v5 = vadd.f32 %v1522_v53, %v1450_v23  ;;  %v3461_v14 = vld [vmem:[#allocation55_spill] sm:$0xff] }
 0x2b0   : > { %v1595_v49 = vadd.f32 %v1522_v53, %v1451_v43  ;;  %v1596_v11 = vadd.f32 %v1522_v53, %v1452_v2  ;;  %v1597_v24 = vadd.f32 %v1522_v53, %v1453_v48  ;;  %v1488_v9 = vmul.f32 %v3039_v41, %v3461_v14  ;;  %v3464_v53 = vld [vmem:[#allocation18_spill] sm:$0xff]  ;;  %v3465_v43 = vld [vmem:[#allocation47_spill] sm:$0xff] }
 0x2b1   : > { %1675 = vst [vmem:[%s3034_s18 + $0x150] sm:$0xff] %v1591_v40  ;;  %v1468_v63 = vmul.f32 %v3023_v35, %v3462_v50  ;;  %v1469_v23 = vmul.f32 %v3023_v35, %v3463_v19  ;;  %v1470_v20 = vmul.f32 %v3023_v35, %v3464_v53  ;;  %v1471_v40 = vmul.f32 %v3023_v35, %v3465_v43 }
 0x2b2   : > { %1676 = vst [vmem:[%s3034_s18 + $0x158] sm:$0xff] %v1592_v22  ;;  %v3466_v22 = vld [vmem:[#allocation45_spill] sm:$0xff]  ;;  %v1473_v48 = vmul.f32 %v3023_v35, %v3467_v37 }
 0x2b3   : > { %1677 = vst [vmem:[%s3034_s18 + $0x160] sm:$0xff] %v1593_v28  ;;  %v1472_v28 = vmul.f32 %v3023_v35, %v3466_v22 }
 0x2b4   : > { %1678 = vst [vmem:[%s3034_s18 + $0x168] sm:$0xff] %v1594_v5 }
 0x2b5   : > { %1679 = vst [vmem:[%s3034_s18 + $0x170] sm:$0xff] %v1595_v49 }
 0x2b6   : > { %1680 = vst [vmem:[%s3034_s18 + $0x178] sm:$0xff] %v1596_v11  ;;  %v1542_v13 = vpop.permute.xlu0 %1541  ;;  %v3468_v11 = vld [vmem:[#allocation48_spill] sm:$0xff] }
 0x2b7   : > { %1681 = vst.msk [vmem:[%s3034_s18 + $0x180] sm:$0xff] %vm761_vm1, %v1597_v24  ;;  %v1619_v52 = vadd.f32 %v1542_v13, %v1475_v6  ;;  %v1620_v17 = vadd.f32 %v1542_v13, %v1476_v61  ;;  %v1621_v57 = vadd.f32 %v1542_v13, %v1477_v45  ;;  %v1622_v25 = vadd.f32 %v1542_v13, %v1478_v56 }
 0x2b8   : > { %v1623_v51 = vadd.f32 %v1542_v13, %v1479_v36  ;;  %v1624_v21 = vadd.f32 %v1542_v13, %v1480_v34  ;;  %v1625_v59 = vadd.f32 %v1542_v13, %v1481_v15  ;;  %v1474_v24 = vmul.f32 %v3023_v35, %v3468_v11 }
 0x2b9   : > { %1703 = vst [vmem:[%s3034_s18 + $0x230] sm:$0xff] %v1619_v52 }
 0x2ba   : > { %1704 = vst [vmem:[%s3034_s18 + $0x238] sm:$0xff] %v1620_v17 }
 0x2bb   : > { %1705 = vst [vmem:[%s3034_s18 + $0x240] sm:$0xff] %v1621_v57 }
 0x2bc   : > { %1706 = vst [vmem:[%s3034_s18 + $0x248] sm:$0xff] %v1622_v25 }
 0x2bd   : > { %1707 = vst [vmem:[%s3034_s18 + $0x250] sm:$0xff] %v1623_v51 }
 0x2be   : > { %1708 = vst [vmem:[%s3034_s18 + $0x258] sm:$0xff] %v1624_v21 }
 0x2bf   : > { %1709 = vst.msk [vmem:[%s3034_s18 + $0x260] sm:$0xff] %vm761_vm1, %v1625_v59  ;;  %v1547_v29 = vpop.permute.xlu2 %1546 }
 0x2c0   : > { %v1626_v0 = vadd.f32 %v1547_v29, %v1482_v54  ;;  %v1627_v12 = vadd.f32 %v1547_v29, %v1483_v32  ;;  %v1628_v47 = vadd.f32 %v1547_v29, %v1484_v16  ;;  %v1629_v4 = vadd.f32 %v1547_v29, %v1485_v62 }
 0x2c1   : > { %v1630_v46 = vadd.f32 %v1547_v29, %v1486_v7  ;;  %v1631_v33 = vadd.f32 %v1547_v29, %v1487_v58  ;;  %v1632_v10 = vadd.f32 %v1547_v29, %v1488_v9 }
 0x2c2   : > { %1710 = vst [vmem:[%s3034_s18 + $0x268] sm:$0xff] %v1626_v0 }
 0x2c3   : > { %1711 = vst [vmem:[%s3034_s18 + $0x270] sm:$0xff] %v1627_v12 }
 0x2c4   : > { %1712 = vst [vmem:[%s3034_s18 + $0x278] sm:$0xff] %v1628_v47 }
 0x2c5   : > { %1713 = vst [vmem:[%s3034_s18 + $0x280] sm:$0xff] %v1629_v4 }
 0x2c6   : > { %1714 = vst [vmem:[%s3034_s18 + $0x288] sm:$0xff] %v1630_v46  ;;  %v1537_v41 = vpop.permute.xlu1 %1536 }
 0x2c7   : > { %1715 = vst [vmem:[%s3034_s18 + $0x290] sm:$0xff] %v1631_v33  ;;  %v1612_v44 = vadd.f32 %v1537_v41, %v1468_v63  ;;  %v1613_v2 = vadd.f32 %v1537_v41, %v1469_v23  ;;  %v1614_v5 = vadd.f32 %v1537_v41, %v1470_v20  ;;  %v1615_v49 = vadd.f32 %v1537_v41, %v1471_v40 }
 0x2c8   : > { %1716 = vst.msk [vmem:[%s3034_s18 + $0x298] sm:$0xff] %vm761_vm1, %v1632_v10  ;;  %v1616_v27 = vadd.f32 %v1537_v41, %v1472_v28  ;;  %v1617_v6 = vadd.f32 %v1537_v41, %v1473_v48  ;;  %v1618_v30 = vadd.f32 %v1537_v41, %v1474_v24 }
 0x2c9   : > { %1696 = vst [vmem:[%s3034_s18 + $0x1f8] sm:$0xff] %v1612_v44 }
 0x2ca   : > { %1697 = vst [vmem:[%s3034_s18 + $0x200] sm:$0xff] %v1613_v2 }
 0x2cb   : > { %1698 = vst [vmem:[%s3034_s18 + $0x208] sm:$0xff] %v1614_v5 }
 0x2cc   : > { %1699 = vst [vmem:[%s3034_s18 + $0x210] sm:$0xff] %v1615_v49 }
 0x2cd   : > { %1700 = vst [vmem:[%s3034_s18 + $0x218] sm:$0xff] %v1616_v27 }
 0x2ce   : > { %1701 = vst [vmem:[%s3034_s18 + $0x220] sm:$0xff] %v1617_v6 }
 0x2cf   : > { %1702 = vst.msk [vmem:[%s3034_s18 + $0x228] sm:$0xff] %vm761_vm1, %v1618_v30 }
 0x2d0 PF: > { %s14_s15 = sadd.s32 1, %s1929_s15  }
 0x2d1   : > { %p11_p4 = scmp.ge.s32.totalorder %s14_s15, 6  }
 0x2d3   :  { %13 = sbr.rel (!%p11_p4) target bundleno = 1 (0x1), region = 69 }

</bundles_post_ra>
